<compile_context>
chip_gen: v7x
topology: tpu7x:2x2x1
jax: 0.10.0
libtpu: 0.0.40
codegen_flags: <defaults>
</compile_context>

<pallas_src>
import math

import jax
import jax.numpy as jnp
import numpy as np
from jax.experimental import pallas as pl
from jax.experimental.pallas import tpu as pltpu


# ----------------------------- Pallas kernel ---------------------------------
def _make_conv_stack_kernel(num_layers):
    """Kernel factory: one image per grid step, all conv/BN/ReLU layers fused.

    Ref layout per grid step (all f32):
      refs[0]                 : x      (1, Cin0, H0*W0)   streamed per-image input
      refs[1 + 3*l + 0]       : G_l    (kh*kw, HW_in, HW_out)  one-hot gather mats (resident)
      refs[1 + 3*l + 1]       : W_l    (kh*kw, Cout, Cin)      per-tap weights, BN scale folded (resident)
      refs[1 + 3*l + 2]       : s_l    (Cout, 1)               folded bias/BN shift (resident)
      refs[-1]                : out    (1, Cout_last, HW_last)
    """

    def kernel(*refs):
        x_ref = refs[0]
        o_ref = refs[-1]
        h = x_ref[0].astype(jnp.float32)            # (Cin, H*W), channels-first flat
        for l in range(num_layers):                 # static unroll over layers
            g_ref = refs[1 + 3 * l + 0]
            w_ref = refs[1 + 3 * l + 1]
            s_ref = refs[1 + 3 * l + 2]
            n_taps = g_ref.shape[0]
            c_out = w_ref.shape[1]
            m_out = g_ref.shape[2]
            acc = jnp.zeros((c_out, m_out), jnp.float32)
            for t in range(n_taps):                 # static unroll over kh*kw taps
                # Gather the (dy,dx)-shifted, stride-decimated pixels on the MXU:
                #   (Cin, HW_in) @ (HW_in, HW_out) -> (Cin, HW_out)
                gathered = jnp.dot(h, g_ref[t], preferred_element_type=jnp.float32)
                # Per-tap weight contraction: (Cout, Cin) @ (Cin, HW_out)
                acc = acc + jnp.dot(w_ref[t], gathered,
                                    preferred_element_type=jnp.float32)
            # Folded conv-bias + BatchNorm (eval) shift, then ReLU.
            h = jnp.maximum(acc + s_ref[...], 0.0)
        o_ref[0] = h.astype(o_ref.dtype)

    return kernel


def conv_module_forward(x_nchw, layers):
    """Fused Pallas forward.  Returns (N, C*H*W) features in PyTorch NCHW flatten order."""
    N, C, H, W = x_nchw.shape
    x_flat = x_nchw.reshape(N, C, H * W)            # free reshape of contiguous NCHW

    in_specs = [pl.BlockSpec((1, C, H * W), lambda n: (n, 0, 0))]   # streamed per image
    args = [x_flat]
    for lp in layers:                                # resident parameters (index_map -> 0)
        g, w, s = lp["gather"], lp["w_taps"], lp["shift"]
        in_specs.append(pl.BlockSpec(g.shape, lambda n: (0, 0, 0)))
        in_specs.append(pl.BlockSpec(w.shape, lambda n: (0, 0, 0)))
        in_specs.append(pl.BlockSpec(s.shape, lambda n: (0, 0)))
        args.extend([g, w, s])

    last = layers[-1]
    c_last = last["c_out"]
    m_last = last["h_out"] * last["w_out"]

    out = pl.pallas_call(
        _make_conv_stack_kernel(len(layers)),
        out_shape=jax.ShapeDtypeStruct((N, c_last, m_last), jnp.float32),
        grid_spec=pltpu.PrefetchScalarGridSpec(
            num_scalar_prefetch=0,
            grid=(N,),                               # >= 2 steps: megacore sharding + pipelining
            in_specs=in_specs,
            out_specs=pl.BlockSpec((1, c_last, m_last), lambda n: (n, 0, 0)),
        ),
        compiler_params=pltpu.CompilerParams(
            dimension_semantics=("parallel",),       # shard the batch across TCs on v7x
            vmem_limit_bytes=32 * 1024 * 1024,       # working set is < 1 MiB; plenty of headroom
        ),
    )(*args)
    # (N, Cout, Ho*Wo) row-major == PyTorch's .view(N, C*H*W) of an NCHW tensor.
    return out.reshape(N, c_last * m_last)


# -------------------------- parameter construction ---------------------------
def make_layer_params(key, c_in, c_out, k, stride, h_in, w_in, eps=1e-5):
    """Deterministic init mirroring nn.Conv2d / nn.BatchNorm2d defaults, plus the
    per-tap folded weights and one-hot gather matrices used by the fused kernel."""
    kw_, kb_ = jax.random.split(key)
    fan_in = c_in * k * k
    bound = 1.0 / math.sqrt(fan_in)
    weight = jax.random.uniform(kw_, (c_out, c_in, k, k), jnp.float32, -bound, bound)
    bias = jax.random.uniform(kb_, (c_out,), jnp.float32, -bound, bound)
    # BatchNorm2d defaults: gamma=1, beta=0, running_mean=0, running_var=1
    gamma = jnp.ones((c_out,), jnp.float32)
    beta = jnp.zeros((c_out,), jnp.float32)
    running_mean = jnp.zeros((c_out,), jnp.float32)
    running_var = jnp.ones((c_out,), jnp.float32)

    scale = gamma / jnp.sqrt(running_var + eps)                 # BN scale, folded into weights
    shift = beta + (bias - running_mean) * scale                # folded bias/BN shift

    h_out = (h_in - k) // stride + 1
    w_out = (w_in - k) // stride + 1

    # Per-tap (Cout, Cin) weight slabs with the BN scale folded in; tap order = (dy, dx) row-major.
    w_taps = jnp.stack(
        [weight[:, :, dy, dx] * scale[:, None] for dy in range(k) for dx in range(k)],
        axis=0)                                                  # (k*k, Cout, Cin)

    # One-hot gather matrices: G[t, p, m] = 1 iff input pixel p feeds output pixel m for tap t.
    G = np.zeros((k * k, h_in * w_in, h_out * w_out), np.float32)
    for t, (dy, dx) in enumerate([(a, b) for a in range(k) for b in range(k)]):
        for i in range(h_out):
            for j in range(w_out):
                G[t, (stride * i + dy) * w_in + (stride * j + dx), i * w_out + j] = 1.0

    return {
        "weight": weight, "bias": bias, "eps": eps,
        "gamma": gamma, "beta": beta,
        "running_mean": running_mean, "running_var": running_var,
        "w_taps": w_taps, "shift": shift.reshape(c_out, 1), "gather": jnp.asarray(G),
        "k": k, "stride": stride, "c_out": c_out, "h_out": h_out, "w_out": w_out,
    }


# ----------------------------- pure-JAX reference -----------------------------
def reference_forward(x_nchw, layers, strides):
    """f32 reference (eval-mode conv + BatchNorm(running stats) + ReLU, then flatten)."""
    x = x_nchw
    for lp, s in zip(layers, strides):
        y = jax.lax.conv_general_dilated(
            x, lp["weight"], window_strides=(s, s), padding="VALID",
            dimension_numbers=("NCHW", "OIHW", "NCHW"),
            precision=jax.lax.Precision.HIGHEST)
        y = y + lp["bias"][None, :, None, None]
        y = (y - lp["running_mean"][None, :, None, None]) / jnp.sqrt(
            lp["running_var"][None, :, None, None] + lp["eps"])
        y = y * lp["gamma"][None, :, None, None] + lp["beta"][None, :, None, None]
        # Dropout2d(p=0.0) is the identity.
        x = jnp.maximum(y, 0.0)
    return x.reshape(x.shape[0], -1)


if __name__ == "__main__":
    # params equivalent of the PyTorch module:
    params = {
        "channels": [4, 8, 16],
        "kernels": [3, 3],
        "strides": [2, 2],
        "dropouts": [0.0, 0.0],     # p=0 -> identity; p>0 training mode not implemented
        "end_layer": True,          # presence-only flag in the reference module
    }

    key = jax.random.PRNGKey(0)
    keys = jax.random.split(key, len(params["channels"]))

    N, H0, W0 = 2, 16, 16
    layers = []
    h, w = H0, W0
    for i in range(len(params["channels"]) - 1):
        lp = make_layer_params(keys[i], params["channels"][i], params["channels"][i + 1],
                               params["kernels"][i], params["strides"][i], h, w)
        layers.append(lp)
        h, w = lp["h_out"], lp["w_out"]

    x = jax.random.normal(keys[-1], (N, params["channels"][0], H0, W0), jnp.float32)  # NCHW

    fwd = jax.jit(lambda xx: conv_module_forward(xx, layers))
    out = jax.block_until_ready(fwd(x))

    ref = reference_forward(x, layers, params["strides"])
    # f32 end-to-end; loose tolerance only to cover MXU f32 multi-pass variation across gens.
    np.testing.assert_allclose(np.asarray(out), np.asarray(ref), rtol=2e-2, atol=2e-2)

    assert out.shape == (N, params["channels"][-1] * h * w)   # (2, 16*3*3)
    print("KERNEL_OK")
</pallas_src>

<mosaic_0001>
module attributes {stable_mosaic.version = 11 : i64} {
  func.func @kernel(%arg0: i32, %arg1: memref<1x4x256xf32, #tpu.memory_space<vmem>>, %arg2: memref<9x256x49xf32, #tpu.memory_space<vmem>>, %arg3: memref<9x8x4xf32, #tpu.memory_space<vmem>>, %arg4: memref<8x1xf32, #tpu.memory_space<vmem>>, %arg5: memref<9x49x9xf32, #tpu.memory_space<vmem>>, %arg6: memref<9x16x8xf32, #tpu.memory_space<vmem>>, %arg7: memref<16x1xf32, #tpu.memory_space<vmem>>, %arg8: memref<1x16x9xf32, #tpu.memory_space<vmem>>) attributes {dimension_semantics = [#tpu.dimension_semantics<parallel>], iteration_bounds = array<i64: 2>, scalar_prefetch = 0 : i64, scratch_operands = 0 : i64, tpu.core_type = #tpu.core_type<tc>, window_params = [{transform_indices = @transform_0, window_bounds = array<i64: 1, 4, 256>}, {pipeline_mode = #tpu.pipeline_mode<synchronous>, transform_indices = @transform_1, window_bounds = array<i64: 9, 256, 49>}, {pipeline_mode = #tpu.pipeline_mode<synchronous>, transform_indices = @transform_2, window_bounds = array<i64: 9, 8, 4>}, {pipeline_mode = #tpu.pipeline_mode<synchronous>, transform_indices = @transform_3, window_bounds = array<i64: 8, 1>}, {pipeline_mode = #tpu.pipeline_mode<synchronous>, transform_indices = @transform_4, window_bounds = array<i64: 9, 49, 9>}, {pipeline_mode = #tpu.pipeline_mode<synchronous>, transform_indices = @transform_5, window_bounds = array<i64: 9, 16, 8>}, {pipeline_mode = #tpu.pipeline_mode<synchronous>, transform_indices = @transform_6, window_bounds = array<i64: 16, 1>}, {transform_indices = @transform_7, window_bounds = array<i64: 1, 16, 9>}]} {
    %c0 = arith.constant 0 : index
    %c0_0 = arith.constant 0 : index
    %c0_1 = arith.constant 0 : index
    %0 = vector.load %arg1[%c0, %c0_0, %c0_1] : memref<1x4x256xf32, #tpu.memory_space<vmem>>, vector<1x4x256xf32>
    %1 = vector.shape_cast %0 : vector<1x4x256xf32> to vector<4x256xf32>
    %cst = arith.constant 0.000000e+00 : f32
    %2 = vector.broadcast %cst : f32 to vector<8x49xf32>
    %c0_2 = arith.constant 0 : index
    %c0_3 = arith.constant 0 : index
    %c0_4 = arith.constant 0 : index
    %3 = vector.load %arg2[%c0_2, %c0_3, %c0_4] : memref<9x256x49xf32, #tpu.memory_space<vmem>>, vector<1x256x49xf32>
    %4 = vector.shape_cast %3 : vector<1x256x49xf32> to vector<256x49xf32>
    %cst_5 = arith.constant dense<0.000000e+00> : vector<4x49xf32>
    %5 = tpu.matmul %1, %4, %cst_5 {dimension_numbers = #tpu.dot_dimension_numbers<[1], [0], [0], [1], [0, 0, 1, 1], [], []>} : vector<4x256xf32>, vector<256x49xf32>, vector<4x49xf32> -> vector<4x49xf32>
    %c0_6 = arith.constant 0 : index
    %c0_7 = arith.constant 0 : index
    %c0_8 = arith.constant 0 : index
    %6 = vector.load %arg3[%c0_6, %c0_7, %c0_8] : memref<9x8x4xf32, #tpu.memory_space<vmem>>, vector<1x8x4xf32>
    %7 = vector.shape_cast %6 : vector<1x8x4xf32> to vector<8x4xf32>
    %cst_9 = arith.constant dense<0.000000e+00> : vector<8x49xf32>
    %8 = tpu.matmul %7, %5, %cst_9 {dimension_numbers = #tpu.dot_dimension_numbers<[1], [0], [0], [1], [0, 0, 1, 1], [], []>} : vector<8x4xf32>, vector<4x49xf32>, vector<8x49xf32> -> vector<8x49xf32>
    %9 = arith.addf %2, %8 : vector<8x49xf32>
    %c1 = arith.constant 1 : index
    %c0_10 = arith.constant 0 : index
    %c0_11 = arith.constant 0 : index
    %10 = vector.load %arg2[%c1, %c0_10, %c0_11] : memref<9x256x49xf32, #tpu.memory_space<vmem>>, vector<1x256x49xf32>
    %11 = vector.shape_cast %10 : vector<1x256x49xf32> to vector<256x49xf32>
    %cst_12 = arith.constant dense<0.000000e+00> : vector<4x49xf32>
    %12 = tpu.matmul %1, %11, %cst_12 {dimension_numbers = #tpu.dot_dimension_numbers<[1], [0], [0], [1], [0, 0, 1, 1], [], []>} : vector<4x256xf32>, vector<256x49xf32>, vector<4x49xf32> -> vector<4x49xf32>
    %c1_13 = arith.constant 1 : index
    %c0_14 = arith.constant 0 : index
    %c0_15 = arith.constant 0 : index
    %13 = vector.load %arg3[%c1_13, %c0_14, %c0_15] : memref<9x8x4xf32, #tpu.memory_space<vmem>>, vector<1x8x4xf32>
    %14 = vector.shape_cast %13 : vector<1x8x4xf32> to vector<8x4xf32>
    %cst_16 = arith.constant dense<0.000000e+00> : vector<8x49xf32>
    %15 = tpu.matmul %14, %12, %cst_16 {dimension_numbers = #tpu.dot_dimension_numbers<[1], [0], [0], [1], [0, 0, 1, 1], [], []>} : vector<8x4xf32>, vector<4x49xf32>, vector<8x49xf32> -> vector<8x49xf32>
    %16 = arith.addf %9, %15 : vector<8x49xf32>
    %c2 = arith.constant 2 : index
    %c0_17 = arith.constant 0 : index
    %c0_18 = arith.constant 0 : index
    %17 = vector.load %arg2[%c2, %c0_17, %c0_18] : memref<9x256x49xf32, #tpu.memory_space<vmem>>, vector<1x256x49xf32>
    %18 = vector.shape_cast %17 : vector<1x256x49xf32> to vector<256x49xf32>
    %cst_19 = arith.constant dense<0.000000e+00> : vector<4x49xf32>
    %19 = tpu.matmul %1, %18, %cst_19 {dimension_numbers = #tpu.dot_dimension_numbers<[1], [0], [0], [1], [0, 0, 1, 1], [], []>} : vector<4x256xf32>, vector<256x49xf32>, vector<4x49xf32> -> vector<4x49xf32>
    %c2_20 = arith.constant 2 : index
    %c0_21 = arith.constant 0 : index
    %c0_22 = arith.constant 0 : index
    %20 = vector.load %arg3[%c2_20, %c0_21, %c0_22] : memref<9x8x4xf32, #tpu.memory_space<vmem>>, vector<1x8x4xf32>
    %21 = vector.shape_cast %20 : vector<1x8x4xf32> to vector<8x4xf32>
    %cst_23 = arith.constant dense<0.000000e+00> : vector<8x49xf32>
    %22 = tpu.matmul %21, %19, %cst_23 {dimension_numbers = #tpu.dot_dimension_numbers<[1], [0], [0], [1], [0, 0, 1, 1], [], []>} : vector<8x4xf32>, vector<4x49xf32>, vector<8x49xf32> -> vector<8x49xf32>
    %23 = arith.addf %16, %22 : vector<8x49xf32>
    %c3 = arith.constant 3 : index
    %c0_24 = arith.constant 0 : index
    %c0_25 = arith.constant 0 : index
    %24 = vector.load %arg2[%c3, %c0_24, %c0_25] : memref<9x256x49xf32, #tpu.memory_space<vmem>>, vector<1x256x49xf32>
    %25 = vector.shape_cast %24 : vector<1x256x49xf32> to vector<256x49xf32>
    %cst_26 = arith.constant dense<0.000000e+00> : vector<4x49xf32>
    %26 = tpu.matmul %1, %25, %cst_26 {dimension_numbers = #tpu.dot_dimension_numbers<[1], [0], [0], [1], [0, 0, 1, 1], [], []>} : vector<4x256xf32>, vector<256x49xf32>, vector<4x49xf32> -> vector<4x49xf32>
    %c3_27 = arith.constant 3 : index
    %c0_28 = arith.constant 0 : index
    %c0_29 = arith.constant 0 : index
    %27 = vector.load %arg3[%c3_27, %c0_28, %c0_29] : memref<9x8x4xf32, #tpu.memory_space<vmem>>, vector<1x8x4xf32>
    %28 = vector.shape_cast %27 : vector<1x8x4xf32> to vector<8x4xf32>
    %cst_30 = arith.constant dense<0.000000e+00> : vector<8x49xf32>
    %29 = tpu.matmul %28, %26, %cst_30 {dimension_numbers = #tpu.dot_dimension_numbers<[1], [0], [0], [1], [0, 0, 1, 1], [], []>} : vector<8x4xf32>, vector<4x49xf32>, vector<8x49xf32> -> vector<8x49xf32>
    %30 = arith.addf %23, %29 : vector<8x49xf32>
    %c4 = arith.constant 4 : index
    %c0_31 = arith.constant 0 : index
    %c0_32 = arith.constant 0 : index
    %31 = vector.load %arg2[%c4, %c0_31, %c0_32] : memref<9x256x49xf32, #tpu.memory_space<vmem>>, vector<1x256x49xf32>
    %32 = vector.shape_cast %31 : vector<1x256x49xf32> to vector<256x49xf32>
    %cst_33 = arith.constant dense<0.000000e+00> : vector<4x49xf32>
    %33 = tpu.matmul %1, %32, %cst_33 {dimension_numbers = #tpu.dot_dimension_numbers<[1], [0], [0], [1], [0, 0, 1, 1], [], []>} : vector<4x256xf32>, vector<256x49xf32>, vector<4x49xf32> -> vector<4x49xf32>
    %c4_34 = arith.constant 4 : index
    %c0_35 = arith.constant 0 : index
    %c0_36 = arith.constant 0 : index
    %34 = vector.load %arg3[%c4_34, %c0_35, %c0_36] : memref<9x8x4xf32, #tpu.memory_space<vmem>>, vector<1x8x4xf32>
    %35 = vector.shape_cast %34 : vector<1x8x4xf32> to vector<8x4xf32>
    %cst_37 = arith.constant dense<0.000000e+00> : vector<8x49xf32>
    %36 = tpu.matmul %35, %33, %cst_37 {dimension_numbers = #tpu.dot_dimension_numbers<[1], [0], [0], [1], [0, 0, 1, 1], [], []>} : vector<8x4xf32>, vector<4x49xf32>, vector<8x49xf32> -> vector<8x49xf32>
    %37 = arith.addf %30, %36 : vector<8x49xf32>
    %c5 = arith.constant 5 : index
    %c0_38 = arith.constant 0 : index
    %c0_39 = arith.constant 0 : index
    %38 = vector.load %arg2[%c5, %c0_38, %c0_39] : memref<9x256x49xf32, #tpu.memory_space<vmem>>, vector<1x256x49xf32>
    %39 = vector.shape_cast %38 : vector<1x256x49xf32> to vector<256x49xf32>
    %cst_40 = arith.constant dense<0.000000e+00> : vector<4x49xf32>
    %40 = tpu.matmul %1, %39, %cst_40 {dimension_numbers = #tpu.dot_dimension_numbers<[1], [0], [0], [1], [0, 0, 1, 1], [], []>} : vector<4x256xf32>, vector<256x49xf32>, vector<4x49xf32> -> vector<4x49xf32>
    %c5_41 = arith.constant 5 : index
    %c0_42 = arith.constant 0 : index
    %c0_43 = arith.constant 0 : index
    %41 = vector.load %arg3[%c5_41, %c0_42, %c0_43] : memref<9x8x4xf32, #tpu.memory_space<vmem>>, vector<1x8x4xf32>
    %42 = vector.shape_cast %41 : vector<1x8x4xf32> to vector<8x4xf32>
    %cst_44 = arith.constant dense<0.000000e+00> : vector<8x49xf32>
    %43 = tpu.matmul %42, %40, %cst_44 {dimension_numbers = #tpu.dot_dimension_numbers<[1], [0], [0], [1], [0, 0, 1, 1], [], []>} : vector<8x4xf32>, vector<4x49xf32>, vector<8x49xf32> -> vector<8x49xf32>
    %44 = arith.addf %37, %43 : vector<8x49xf32>
    %c6 = arith.constant 6 : index
    %c0_45 = arith.constant 0 : index
    %c0_46 = arith.constant 0 : index
    %45 = vector.load %arg2[%c6, %c0_45, %c0_46] : memref<9x256x49xf32, #tpu.memory_space<vmem>>, vector<1x256x49xf32>
    %46 = vector.shape_cast %45 : vector<1x256x49xf32> to vector<256x49xf32>
    %cst_47 = arith.constant dense<0.000000e+00> : vector<4x49xf32>
    %47 = tpu.matmul %1, %46, %cst_47 {dimension_numbers = #tpu.dot_dimension_numbers<[1], [0], [0], [1], [0, 0, 1, 1], [], []>} : vector<4x256xf32>, vector<256x49xf32>, vector<4x49xf32> -> vector<4x49xf32>
    %c6_48 = arith.constant 6 : index
    %c0_49 = arith.constant 0 : index
    %c0_50 = arith.constant 0 : index
    %48 = vector.load %arg3[%c6_48, %c0_49, %c0_50] : memref<9x8x4xf32, #tpu.memory_space<vmem>>, vector<1x8x4xf32>
    %49 = vector.shape_cast %48 : vector<1x8x4xf32> to vector<8x4xf32>
    %cst_51 = arith.constant dense<0.000000e+00> : vector<8x49xf32>
    %50 = tpu.matmul %49, %47, %cst_51 {dimension_numbers = #tpu.dot_dimension_numbers<[1], [0], [0], [1], [0, 0, 1, 1], [], []>} : vector<8x4xf32>, vector<4x49xf32>, vector<8x49xf32> -> vector<8x49xf32>
    %51 = arith.addf %44, %50 : vector<8x49xf32>
    %c7 = arith.constant 7 : index
    %c0_52 = arith.constant 0 : index
    %c0_53 = arith.constant 0 : index
    %52 = vector.load %arg2[%c7, %c0_52, %c0_53] : memref<9x256x49xf32, #tpu.memory_space<vmem>>, vector<1x256x49xf32>
    %53 = vector.shape_cast %52 : vector<1x256x49xf32> to vector<256x49xf32>
    %cst_54 = arith.constant dense<0.000000e+00> : vector<4x49xf32>
    %54 = tpu.matmul %1, %53, %cst_54 {dimension_numbers = #tpu.dot_dimension_numbers<[1], [0], [0], [1], [0, 0, 1, 1], [], []>} : vector<4x256xf32>, vector<256x49xf32>, vector<4x49xf32> -> vector<4x49xf32>
    %c7_55 = arith.constant 7 : index
    %c0_56 = arith.constant 0 : index
    %c0_57 = arith.constant 0 : index
    %55 = vector.load %arg3[%c7_55, %c0_56, %c0_57] : memref<9x8x4xf32, #tpu.memory_space<vmem>>, vector<1x8x4xf32>
    %56 = vector.shape_cast %55 : vector<1x8x4xf32> to vector<8x4xf32>
    %cst_58 = arith.constant dense<0.000000e+00> : vector<8x49xf32>
    %57 = tpu.matmul %56, %54, %cst_58 {dimension_numbers = #tpu.dot_dimension_numbers<[1], [0], [0], [1], [0, 0, 1, 1], [], []>} : vector<8x4xf32>, vector<4x49xf32>, vector<8x49xf32> -> vector<8x49xf32>
    %58 = arith.addf %51, %57 : vector<8x49xf32>
    %c8 = arith.constant 8 : index
    %c0_59 = arith.constant 0 : index
    %c0_60 = arith.constant 0 : index
    %59 = vector.load %arg2[%c8, %c0_59, %c0_60] : memref<9x256x49xf32, #tpu.memory_space<vmem>>, vector<1x256x49xf32>
    %60 = vector.shape_cast %59 : vector<1x256x49xf32> to vector<256x49xf32>
    %cst_61 = arith.constant dense<0.000000e+00> : vector<4x49xf32>
    %61 = tpu.matmul %1, %60, %cst_61 {dimension_numbers = #tpu.dot_dimension_numbers<[1], [0], [0], [1], [0, 0, 1, 1], [], []>} : vector<4x256xf32>, vector<256x49xf32>, vector<4x49xf32> -> vector<4x49xf32>
    %c8_62 = arith.constant 8 : index
    %c0_63 = arith.constant 0 : index
    %c0_64 = arith.constant 0 : index
    %62 = vector.load %arg3[%c8_62, %c0_63, %c0_64] : memref<9x8x4xf32, #tpu.memory_space<vmem>>, vector<1x8x4xf32>
    %63 = vector.shape_cast %62 : vector<1x8x4xf32> to vector<8x4xf32>
    %cst_65 = arith.constant dense<0.000000e+00> : vector<8x49xf32>
    %64 = tpu.matmul %63, %61, %cst_65 {dimension_numbers = #tpu.dot_dimension_numbers<[1], [0], [0], [1], [0, 0, 1, 1], [], []>} : vector<8x4xf32>, vector<4x49xf32>, vector<8x49xf32> -> vector<8x49xf32>
    %65 = arith.addf %58, %64 : vector<8x49xf32>
    %c0_66 = arith.constant 0 : index
    %c0_67 = arith.constant 0 : index
    %66 = vector.load %arg4[%c0_66, %c0_67] : memref<8x1xf32, #tpu.memory_space<vmem>>, vector<8x1xf32>
    %67 = vector.broadcast %66 : vector<8x1xf32> to vector<8x49xf32>
    %68 = arith.addf %65, %67 : vector<8x49xf32>
    %cst_68 = arith.constant 0.000000e+00 : f32
    %69 = vector.broadcast %cst_68 : f32 to vector<8x49xf32>
    %70 = arith.maximumf %68, %69 : vector<8x49xf32>
    %cst_69 = arith.constant 0.000000e+00 : f32
    %71 = vector.broadcast %cst_69 : f32 to vector<16x9xf32>
    %c0_70 = arith.constant 0 : index
    %c0_71 = arith.constant 0 : index
    %c0_72 = arith.constant 0 : index
    %72 = vector.load %arg5[%c0_70, %c0_71, %c0_72] : memref<9x49x9xf32, #tpu.memory_space<vmem>>, vector<1x49x9xf32>
    %73 = vector.shape_cast %72 : vector<1x49x9xf32> to vector<49x9xf32>
    %cst_73 = arith.constant dense<0.000000e+00> : vector<8x9xf32>
    %74 = tpu.matmul %70, %73, %cst_73 {dimension_numbers = #tpu.dot_dimension_numbers<[1], [0], [0], [1], [0, 0, 1, 1], [], []>} : vector<8x49xf32>, vector<49x9xf32>, vector<8x9xf32> -> vector<8x9xf32>
    %c0_74 = arith.constant 0 : index
    %c0_75 = arith.constant 0 : index
    %c0_76 = arith.constant 0 : index
    %75 = vector.load %arg6[%c0_74, %c0_75, %c0_76] : memref<9x16x8xf32, #tpu.memory_space<vmem>>, vector<1x16x8xf32>
    %76 = vector.shape_cast %75 : vector<1x16x8xf32> to vector<16x8xf32>
    %cst_77 = arith.constant dense<0.000000e+00> : vector<16x9xf32>
    %77 = tpu.matmul %76, %74, %cst_77 {dimension_numbers = #tpu.dot_dimension_numbers<[1], [0], [0], [1], [0, 0, 1, 1], [], []>} : vector<16x8xf32>, vector<8x9xf32>, vector<16x9xf32> -> vector<16x9xf32>
    %78 = arith.addf %71, %77 : vector<16x9xf32>
    %c1_78 = arith.constant 1 : index
    %c0_79 = arith.constant 0 : index
    %c0_80 = arith.constant 0 : index
    %79 = vector.load %arg5[%c1_78, %c0_79, %c0_80] : memref<9x49x9xf32, #tpu.memory_space<vmem>>, vector<1x49x9xf32>
    %80 = vector.shape_cast %79 : vector<1x49x9xf32> to vector<49x9xf32>
    %cst_81 = arith.constant dense<0.000000e+00> : vector<8x9xf32>
    %81 = tpu.matmul %70, %80, %cst_81 {dimension_numbers = #tpu.dot_dimension_numbers<[1], [0], [0], [1], [0, 0, 1, 1], [], []>} : vector<8x49xf32>, vector<49x9xf32>, vector<8x9xf32> -> vector<8x9xf32>
    %c1_82 = arith.constant 1 : index
    %c0_83 = arith.constant 0 : index
    %c0_84 = arith.constant 0 : index
    %82 = vector.load %arg6[%c1_82, %c0_83, %c0_84] : memref<9x16x8xf32, #tpu.memory_space<vmem>>, vector<1x16x8xf32>
    %83 = vector.shape_cast %82 : vector<1x16x8xf32> to vector<16x8xf32>
    %cst_85 = arith.constant dense<0.000000e+00> : vector<16x9xf32>
    %84 = tpu.matmul %83, %81, %cst_85 {dimension_numbers = #tpu.dot_dimension_numbers<[1], [0], [0], [1], [0, 0, 1, 1], [], []>} : vector<16x8xf32>, vector<8x9xf32>, vector<16x9xf32> -> vector<16x9xf32>
    %85 = arith.addf %78, %84 : vector<16x9xf32>
    %c2_86 = arith.constant 2 : index
    %c0_87 = arith.constant 0 : index
    %c0_88 = arith.constant 0 : index
    %86 = vector.load %arg5[%c2_86, %c0_87, %c0_88] : memref<9x49x9xf32, #tpu.memory_space<vmem>>, vector<1x49x9xf32>
    %87 = vector.shape_cast %86 : vector<1x49x9xf32> to vector<49x9xf32>
    %cst_89 = arith.constant dense<0.000000e+00> : vector<8x9xf32>
    %88 = tpu.matmul %70, %87, %cst_89 {dimension_numbers = #tpu.dot_dimension_numbers<[1], [0], [0], [1], [0, 0, 1, 1], [], []>} : vector<8x49xf32>, vector<49x9xf32>, vector<8x9xf32> -> vector<8x9xf32>
    %c2_90 = arith.constant 2 : index
    %c0_91 = arith.constant 0 : index
    %c0_92 = arith.constant 0 : index
    %89 = vector.load %arg6[%c2_90, %c0_91, %c0_92] : memref<9x16x8xf32, #tpu.memory_space<vmem>>, vector<1x16x8xf32>
    %90 = vector.shape_cast %89 : vector<1x16x8xf32> to vector<16x8xf32>
    %cst_93 = arith.constant dense<0.000000e+00> : vector<16x9xf32>
    %91 = tpu.matmul %90, %88, %cst_93 {dimension_numbers = #tpu.dot_dimension_numbers<[1], [0], [0], [1], [0, 0, 1, 1], [], []>} : vector<16x8xf32>, vector<8x9xf32>, vector<16x9xf32> -> vector<16x9xf32>
    %92 = arith.addf %85, %91 : vector<16x9xf32>
    %c3_94 = arith.constant 3 : index
    %c0_95 = arith.constant 0 : index
    %c0_96 = arith.constant 0 : index
    %93 = vector.load %arg5[%c3_94, %c0_95, %c0_96] : memref<9x49x9xf32, #tpu.memory_space<vmem>>, vector<1x49x9xf32>
    %94 = vector.shape_cast %93 : vector<1x49x9xf32> to vector<49x9xf32>
    %cst_97 = arith.constant dense<0.000000e+00> : vector<8x9xf32>
    %95 = tpu.matmul %70, %94, %cst_97 {dimension_numbers = #tpu.dot_dimension_numbers<[1], [0], [0], [1], [0, 0, 1, 1], [], []>} : vector<8x49xf32>, vector<49x9xf32>, vector<8x9xf32> -> vector<8x9xf32>
    %c3_98 = arith.constant 3 : index
    %c0_99 = arith.constant 0 : index
    %c0_100 = arith.constant 0 : index
    %96 = vector.load %arg6[%c3_98, %c0_99, %c0_100] : memref<9x16x8xf32, #tpu.memory_space<vmem>>, vector<1x16x8xf32>
    %97 = vector.shape_cast %96 : vector<1x16x8xf32> to vector<16x8xf32>
    %cst_101 = arith.constant dense<0.000000e+00> : vector<16x9xf32>
    %98 = tpu.matmul %97, %95, %cst_101 {dimension_numbers = #tpu.dot_dimension_numbers<[1], [0], [0], [1], [0, 0, 1, 1], [], []>} : vector<16x8xf32>, vector<8x9xf32>, vector<16x9xf32> -> vector<16x9xf32>
    %99 = arith.addf %92, %98 : vector<16x9xf32>
    %c4_102 = arith.constant 4 : index
    %c0_103 = arith.constant 0 : index
    %c0_104 = arith.constant 0 : index
    %100 = vector.load %arg5[%c4_102, %c0_103, %c0_104] : memref<9x49x9xf32, #tpu.memory_space<vmem>>, vector<1x49x9xf32>
    %101 = vector.shape_cast %100 : vector<1x49x9xf32> to vector<49x9xf32>
    %cst_105 = arith.constant dense<0.000000e+00> : vector<8x9xf32>
    %102 = tpu.matmul %70, %101, %cst_105 {dimension_numbers = #tpu.dot_dimension_numbers<[1], [0], [0], [1], [0, 0, 1, 1], [], []>} : vector<8x49xf32>, vector<49x9xf32>, vector<8x9xf32> -> vector<8x9xf32>
    %c4_106 = arith.constant 4 : index
    %c0_107 = arith.constant 0 : index
    %c0_108 = arith.constant 0 : index
    %103 = vector.load %arg6[%c4_106, %c0_107, %c0_108] : memref<9x16x8xf32, #tpu.memory_space<vmem>>, vector<1x16x8xf32>
    %104 = vector.shape_cast %103 : vector<1x16x8xf32> to vector<16x8xf32>
    %cst_109 = arith.constant dense<0.000000e+00> : vector<16x9xf32>
    %105 = tpu.matmul %104, %102, %cst_109 {dimension_numbers = #tpu.dot_dimension_numbers<[1], [0], [0], [1], [0, 0, 1, 1], [], []>} : vector<16x8xf32>, vector<8x9xf32>, vector<16x9xf32> -> vector<16x9xf32>
    %106 = arith.addf %99, %105 : vector<16x9xf32>
    %c5_110 = arith.constant 5 : index
    %c0_111 = arith.constant 0 : index
    %c0_112 = arith.constant 0 : index
    %107 = vector.load %arg5[%c5_110, %c0_111, %c0_112] : memref<9x49x9xf32, #tpu.memory_space<vmem>>, vector<1x49x9xf32>
    %108 = vector.shape_cast %107 : vector<1x49x9xf32> to vector<49x9xf32>
    %cst_113 = arith.constant dense<0.000000e+00> : vector<8x9xf32>
    %109 = tpu.matmul %70, %108, %cst_113 {dimension_numbers = #tpu.dot_dimension_numbers<[1], [0], [0], [1], [0, 0, 1, 1], [], []>} : vector<8x49xf32>, vector<49x9xf32>, vector<8x9xf32> -> vector<8x9xf32>
    %c5_114 = arith.constant 5 : index
    %c0_115 = arith.constant 0 : index
    %c0_116 = arith.constant 0 : index
    %110 = vector.load %arg6[%c5_114, %c0_115, %c0_116] : memref<9x16x8xf32, #tpu.memory_space<vmem>>, vector<1x16x8xf32>
    %111 = vector.shape_cast %110 : vector<1x16x8xf32> to vector<16x8xf32>
    %cst_117 = arith.constant dense<0.000000e+00> : vector<16x9xf32>
    %112 = tpu.matmul %111, %109, %cst_117 {dimension_numbers = #tpu.dot_dimension_numbers<[1], [0], [0], [1], [0, 0, 1, 1], [], []>} : vector<16x8xf32>, vector<8x9xf32>, vector<16x9xf32> -> vector<16x9xf32>
    %113 = arith.addf %106, %112 : vector<16x9xf32>
    %c6_118 = arith.constant 6 : index
    %c0_119 = arith.constant 0 : index
    %c0_120 = arith.constant 0 : index
    %114 = vector.load %arg5[%c6_118, %c0_119, %c0_120] : memref<9x49x9xf32, #tpu.memory_space<vmem>>, vector<1x49x9xf32>
    %115 = vector.shape_cast %114 : vector<1x49x9xf32> to vector<49x9xf32>
    %cst_121 = arith.constant dense<0.000000e+00> : vector<8x9xf32>
    %116 = tpu.matmul %70, %115, %cst_121 {dimension_numbers = #tpu.dot_dimension_numbers<[1], [0], [0], [1], [0, 0, 1, 1], [], []>} : vector<8x49xf32>, vector<49x9xf32>, vector<8x9xf32> -> vector<8x9xf32>
    %c6_122 = arith.constant 6 : index
    %c0_123 = arith.constant 0 : index
    %c0_124 = arith.constant 0 : index
    %117 = vector.load %arg6[%c6_122, %c0_123, %c0_124] : memref<9x16x8xf32, #tpu.memory_space<vmem>>, vector<1x16x8xf32>
    %118 = vector.shape_cast %117 : vector<1x16x8xf32> to vector<16x8xf32>
    %cst_125 = arith.constant dense<0.000000e+00> : vector<16x9xf32>
    %119 = tpu.matmul %118, %116, %cst_125 {dimension_numbers = #tpu.dot_dimension_numbers<[1], [0], [0], [1], [0, 0, 1, 1], [], []>} : vector<16x8xf32>, vector<8x9xf32>, vector<16x9xf32> -> vector<16x9xf32>
    %120 = arith.addf %113, %119 : vector<16x9xf32>
    %c7_126 = arith.constant 7 : index
    %c0_127 = arith.constant 0 : index
    %c0_128 = arith.constant 0 : index
    %121 = vector.load %arg5[%c7_126, %c0_127, %c0_128] : memref<9x49x9xf32, #tpu.memory_space<vmem>>, vector<1x49x9xf32>
    %122 = vector.shape_cast %121 : vector<1x49x9xf32> to vector<49x9xf32>
    %cst_129 = arith.constant dense<0.000000e+00> : vector<8x9xf32>
    %123 = tpu.matmul %70, %122, %cst_129 {dimension_numbers = #tpu.dot_dimension_numbers<[1], [0], [0], [1], [0, 0, 1, 1], [], []>} : vector<8x49xf32>, vector<49x9xf32>, vector<8x9xf32> -> vector<8x9xf32>
    %c7_130 = arith.constant 7 : index
    %c0_131 = arith.constant 0 : index
    %c0_132 = arith.constant 0 : index
    %124 = vector.load %arg6[%c7_130, %c0_131, %c0_132] : memref<9x16x8xf32, #tpu.memory_space<vmem>>, vector<1x16x8xf32>
    %125 = vector.shape_cast %124 : vector<1x16x8xf32> to vector<16x8xf32>
    %cst_133 = arith.constant dense<0.000000e+00> : vector<16x9xf32>
    %126 = tpu.matmul %125, %123, %cst_133 {dimension_numbers = #tpu.dot_dimension_numbers<[1], [0], [0], [1], [0, 0, 1, 1], [], []>} : vector<16x8xf32>, vector<8x9xf32>, vector<16x9xf32> -> vector<16x9xf32>
    %127 = arith.addf %120, %126 : vector<16x9xf32>
    %c8_134 = arith.constant 8 : index
    %c0_135 = arith.constant 0 : index
    %c0_136 = arith.constant 0 : index
    %128 = vector.load %arg5[%c8_134, %c0_135, %c0_136] : memref<9x49x9xf32, #tpu.memory_space<vmem>>, vector<1x49x9xf32>
    %129 = vector.shape_cast %128 : vector<1x49x9xf32> to vector<49x9xf32>
    %cst_137 = arith.constant dense<0.000000e+00> : vector<8x9xf32>
    %130 = tpu.matmul %70, %129, %cst_137 {dimension_numbers = #tpu.dot_dimension_numbers<[1], [0], [0], [1], [0, 0, 1, 1], [], []>} : vector<8x49xf32>, vector<49x9xf32>, vector<8x9xf32> -> vector<8x9xf32>
    %c8_138 = arith.constant 8 : index
    %c0_139 = arith.constant 0 : index
    %c0_140 = arith.constant 0 : index
    %131 = vector.load %arg6[%c8_138, %c0_139, %c0_140] : memref<9x16x8xf32, #tpu.memory_space<vmem>>, vector<1x16x8xf32>
    %132 = vector.shape_cast %131 : vector<1x16x8xf32> to vector<16x8xf32>
    %cst_141 = arith.constant dense<0.000000e+00> : vector<16x9xf32>
    %133 = tpu.matmul %132, %130, %cst_141 {dimension_numbers = #tpu.dot_dimension_numbers<[1], [0], [0], [1], [0, 0, 1, 1], [], []>} : vector<16x8xf32>, vector<8x9xf32>, vector<16x9xf32> -> vector<16x9xf32>
    %134 = arith.addf %127, %133 : vector<16x9xf32>
    %c0_142 = arith.constant 0 : index
    %c0_143 = arith.constant 0 : index
    %135 = vector.load %arg7[%c0_142, %c0_143] : memref<16x1xf32, #tpu.memory_space<vmem>>, vector<16x1xf32>
    %136 = vector.broadcast %135 : vector<16x1xf32> to vector<16x9xf32>
    %137 = arith.addf %134, %136 : vector<16x9xf32>
    %cst_144 = arith.constant 0.000000e+00 : f32
    %138 = vector.broadcast %cst_144 : f32 to vector<16x9xf32>
    %139 = arith.maximumf %137, %138 : vector<16x9xf32>
    %c0_145 = arith.constant 0 : index
    %c0_146 = arith.constant 0 : index
    %c0_147 = arith.constant 0 : index
    %140 = vector.load %arg8[%c0_145, %c0_146, %c0_147] : memref<1x16x9xf32, #tpu.memory_space<vmem>>, vector<1x16x9xf32>
    %141 = vector.shape_cast %140 : vector<1x16x9xf32> to vector<16x9xf32>
    %142 = vector.shape_cast %139 : vector<16x9xf32> to vector<1x16x9xf32>
    tpu.vector_store %arg8[%c0_145, %c0_146, %c0_147], %142 {strides = array<i32>} : memref<1x16x9xf32, #tpu.memory_space<vmem>>, vector<1x16x9xf32>,
    return
  }
  func.func @transform_0(%arg0: i32) -> (i32, i32, i32) {
    %c0_i32 = arith.constant 0 : i32
    %c0_i32_0 = arith.constant 0 : i32
    %c0_i32_1 = arith.constant 0 : i32
    return %arg0, %c0_i32, %c0_i32_0 : i32, i32, i32
  }
  func.func @transform_1(%arg0: i32) -> (i32, i32, i32) {
    %c0_i32 = arith.constant 0 : i32
    %c0_i32_0 = arith.constant 0 : i32
    %c0_i32_1 = arith.constant 0 : i32
    %c0_i32_2 = arith.constant 0 : i32
    return %c0_i32, %c0_i32_0, %c0_i32_1 : i32, i32, i32
  }
  func.func @transform_2(%arg0: i32) -> (i32, i32, i32) {
    %c0_i32 = arith.constant 0 : i32
    %c0_i32_0 = arith.constant 0 : i32
    %c0_i32_1 = arith.constant 0 : i32
    %c0_i32_2 = arith.constant 0 : i32
    return %c0_i32, %c0_i32_0, %c0_i32_1 : i32, i32, i32
  }
  func.func @transform_3(%arg0: i32) -> (i32, i32) {
    %c0_i32 = arith.constant 0 : i32
    %c0_i32_0 = arith.constant 0 : i32
    %c0_i32_1 = arith.constant 0 : i32
    return %c0_i32, %c0_i32_0 : i32, i32
  }
  func.func @transform_4(%arg0: i32) -> (i32, i32, i32) {
    %c0_i32 = arith.constant 0 : i32
    %c0_i32_0 = arith.constant 0 : i32
    %c0_i32_1 = arith.constant 0 : i32
    %c0_i32_2 = arith.constant 0 : i32
    return %c0_i32, %c0_i32_0, %c0_i32_1 : i32, i32, i32
  }
  func.func @transform_5(%arg0: i32) -> (i32, i32, i32) {
    %c0_i32 = arith.constant 0 : i32
    %c0_i32_0 = arith.constant 0 : i32
    %c0_i32_1 = arith.constant 0 : i32
    %c0_i32_2 = arith.constant 0 : i32
    return %c0_i32, %c0_i32_0, %c0_i32_1 : i32, i32, i32
  }
  func.func @transform_6(%arg0: i32) -> (i32, i32) {
    %c0_i32 = arith.constant 0 : i32
    %c0_i32_0 = arith.constant 0 : i32
    %c0_i32_1 = arith.constant 0 : i32
    return %c0_i32, %c0_i32_0 : i32, i32
  }
  func.func @transform_7(%arg0: i32) -> (i32, i32, i32) {
    %c0_i32 = arith.constant 0 : i32
    %c0_i32_0 = arith.constant 0 : i32
    %c0_i32_1 = arith.constant 0 : i32
    return %arg0, %c0_i32, %c0_i32_0 : i32, i32, i32
  }
}

</mosaic_0001>

<bundles_post_ra>
// kernel: _lambda_.1
= control target key start
LH: loop header
LB: loop body
LE: loop exit
PB: predicated region body
PF: predicated region fallthrough
CT: control target
= control target key end

     0   :  { %12 = vsyncpa [#allocation3], 0  ;;  %s5514_s0 = inlined_call_operand.vmem [shape: f32[2,4,256], index: 0, kind: input, shape index: {}]   ;;  %s5515_s1 = inlined_call_operand.hbm [shape: f32[9,256,49], index: 1, kind: input, shape index: {}]   ;;  %s5516_s2 = inlined_call_operand.hbm [shape: f32[9,8,4], index: 2, kind: input, shape index: {}]   ;;  %s5517_s3 = inlined_call_operand.hbm [shape: f32[8,1], index: 3, kind: input, shape index: {}]   ;;  %s5518_s4 = inlined_call_operand.hbm [shape: f32[9,49,9], index: 4, kind: input, shape index: {}]   ;;  %s5519_s5 = inlined_call_operand.hbm [shape: f32[9,16,8], index: 5, kind: input, shape index: {}]   ;;  %s5520_s6 = inlined_call_operand.hbm [shape: f32[16,1], index: 6, kind: input, shape index: {}]   ;;  %s5521_s7 = inlined_call_operand.vmem [shape: f32[2,16,9], index: 7, kind: output, shape index: {}]  }
   0x1   :  { %13 = vsyncpa [#allocation5], 0 }
   0x2   :  { %14 = vsyncpa [#allocation8], 0 }
   0x3   :  { %15 = vsyncpa [#allocation11], 0  ;;  %s5112_s24 = smov 0  }
   0x4 LB: > { %s5118_s25 = sadd.s32 4294967295, %s5058_s24   ;;  %p3652_p0 = scmp.ge.s32.totalorder %s5058_s24, 1  ;;  %s5058_s24 = sphi %s5112_s24, %s21_s24  }
   0x5   : > { %p204_p1 = scmp.lt.s32.totalorder %s5058_s24, 3  ;;  %p5522_p2 = scmp.eq.s32.totalorder %s5118_s25, 0 }
   0x6   : > { %s5060_s27 = smov [#allocation4]   ;;  %s5061_s29 = smov [#allocation7]  }
   0x7   : > { %p5123_p3 = pnand %p3652_p0, %p204_p1  ;;  %s229_s28 = sshll.u32 %s5060_s27, 4  ;;  %s5127_s28 = int_to_ptr.vmem [resolvable:$true] %s229_s28 }
   0x8   : > { %s253_s30 = sshll.u32 %s5061_s29, 4  ;;  %s5062_s9 = smov [#allocation2]   ;;  %s5131_s30 = int_to_ptr.vmem [resolvable:$true] %s253_s30 }
   0x9   : > { %s5524_s26 = scalar_select %p5123_p3, 1, 0 }
   0xa   : > { %p4813_p4 = pneg %p5123_p3  ;;  %s216_s10 = sshll.u32 %s5062_s9, 4  ;;  %s5139_s10 = int_to_ptr.vmem [resolvable:$true] %s216_s10 }
   0xb   : > { %s5063_s11 = smov [#allocation6]   ;;  %s4868_s15 = scalar_lea.hbm %s5516_s2, 1152 }
   0xc   : > { %p5135_p5 = pnand %p5522_p2, %p4813_p4  ;;  %s5141_s12 = sshll.u32 %s5063_s11, 4  ;;  %s244_s12 = int_to_ptr.vmem [resolvable:$true] %s5141_s12 }
   0xd   : > { %p4869_p6 = scmp.ne.s32.totalorder %s5516_s2, %s4868_s15  ;;  %p4875_p10 = scmp.lt.u32.totalorder %s4868_s15, %s5516_s2 }
   0xe   : > { %p5151_p7 = pneg %p5135_p5 }
  0x10   : > { %p4871_p8 = pnand %p5151_p7, %p4869_p6 }
  0x12   : > { %p4872_p9 = pneg %p4871_p8 }
  0x14   : > { %p4877_p11 = pnand %p4875_p10, %p4872_p9 }
  0x16   : > { %4880 = shalt.err (!%p4877_p11)
}
  0x17   : > { %s4881_s21 = scalar_lea.vmem %s5127_s28, 1152  ;;  %p4889_p1 = scmp.lt.s32.totalorder %s5127_s28, %s5127_s28 }
  0x18   : > { %p4882_p12 = scmp.ne.s32.totalorder %s5127_s28, %s4881_s21  ;;  %p4890_p4 = scmp.lt.s32.totalorder %s4881_s21, %s4881_s21 }
  0x1a   : > { %p4884_p13 = pnand %p4882_p12, %p5151_p7  ;;  %p4891_p6 = por %p4890_p4, %p4889_p1 }
  0x1c   : > { %p4885_p0 = pneg %p4884_p13 }
  0x1e   : > { %p4892_p8 = pnand %p4891_p6, %p4885_p0 }
  0x20   : > { %4895 = shalt.err (!%p4892_p8)
}
  0x21   : > { %s5064_s22 = smov 128   ;;  %s5065_s23 = smov 8  }
  0x22   : > { %4819 = dma.hbm_to_vmem [thread:$0]  (!%p5135_p5), %s5516_s2, 1152, %s5127_s28, [#allocation5], %s5064_s22, %s5064_s22, %s5065_s23  }
  0x23   : > { %s4896_s13 = scalar_lea.hbm %s5518_s4, 8064 }
  0x24   : > { %p4897_p9 = scmp.ne.s32.totalorder %s5518_s4, %s4896_s13  ;;  %p4903_p12 = scmp.lt.u32.totalorder %s4896_s13, %s5518_s4 }
  0x26   : > { %p4899_p10 = pnand %p4897_p9, %p5151_p7 }
  0x28   : > { %p4900_p11 = pneg %p4899_p10 }
  0x2a   : > { %p4905_p13 = pnand %p4903_p12, %p4900_p11 }
  0x2c   : > { %4908 = shalt.err (!%p4905_p13)
}
  0x2d   : > { %s4909_s28 = scalar_lea.vmem %s5131_s30, 8064  ;;  %p4917_p6 = scmp.lt.s32.totalorder %s5131_s30, %s5131_s30 }
  0x2e   : > { %p4910_p0 = scmp.ne.s32.totalorder %s5131_s30, %s4909_s28  ;;  %p4918_p8 = scmp.lt.s32.totalorder %s4909_s28, %s4909_s28 }
  0x30   : > { %p4912_p1 = pnand %p4910_p0, %p5151_p7  ;;  %p4919_p9 = por %p4918_p8, %p4917_p6 }
  0x32   : > { %p4913_p4 = pneg %p4912_p1 }
  0x34   : > { %p4920_p10 = pnand %p4919_p9, %p4913_p4 }
  0x36   : > { %4923 = shalt.err (!%p4920_p10)
}
  0x37   : > { %4825 = dma.hbm_to_vmem [thread:$0]  (!%p5135_p5), %s5518_s4, 8064, %s5131_s30, [#allocation8], %s5064_s22, %s5064_s22, %s5065_s23  }
  0x38   : > { %s4924_s29 = scalar_lea.hbm %s5515_s1, 36864 }
  0x39   : > { %p4925_p11 = scmp.ne.s32.totalorder %s5515_s1, %s4924_s29  ;;  %p4931_p0 = scmp.lt.u32.totalorder %s4924_s29, %s5515_s1 }
  0x3b   : > { %p4927_p12 = pnand %p4925_p11, %p5151_p7 }
  0x3d   : > { %p4928_p13 = pneg %p4927_p12 }
  0x3f   : > { %p4933_p1 = pnand %p4931_p0, %p4928_p13 }
  0x41   : > { %4936 = shalt.err (!%p4933_p1)
}
  0x42   : > { %s4937_s30 = scalar_lea.vmem %s5139_s10, 36864  ;;  %p4945_p9 = scmp.lt.s32.totalorder %s5139_s10, %s5139_s10 }
  0x43   : > { %p4938_p4 = scmp.ne.s32.totalorder %s5139_s10, %s4937_s30  ;;  %p4946_p10 = scmp.lt.s32.totalorder %s4937_s30, %s4937_s30 }
  0x45   : > { %p4940_p6 = pnand %p4938_p4, %p5151_p7  ;;  %p4947_p11 = por %p4946_p10, %p4945_p9 }
  0x47   : > { %p4941_p8 = pneg %p4940_p6 }
  0x49   : > { %p4948_p12 = pnand %p4947_p11, %p4941_p8 }
  0x4b   : > { %4951 = shalt.err (!%p4948_p12)
}
  0x4c   : > { %4816 = dma.hbm_to_vmem [thread:$0]  (!%p5135_p5), %s5515_s1, 36864, %s5139_s10, [#allocation3], %s5064_s22, %s5064_s22, %s5065_s23  }
  0x4d   : > { %s4952_s19 = scalar_lea.hbm %s5517_s3, 128 }
  0x4e   : > { %p4953_p13 = scmp.ne.s32.totalorder %s5517_s3, %s4952_s19  ;;  %p4959_p4 = scmp.lt.u32.totalorder %s4952_s19, %s5517_s3 }
  0x50   : > { %p4955_p0 = pnand %p4953_p13, %p5151_p7 }
  0x52   : > { %p4956_p1 = pneg %p4955_p0 }
  0x54   : > { %p4961_p6 = pnand %p4959_p4, %p4956_p1 }
  0x56   : > { %4964 = shalt.err (!%p4961_p6)
}
  0x57   : > { %s4965_s9 = scalar_lea.vmem %s244_s12, 128  ;;  %p4973_p11 = scmp.lt.s32.totalorder %s244_s12, %s244_s12 }
  0x58   : > { %p4966_p8 = scmp.ne.s32.totalorder %s244_s12, %s4965_s9  ;;  %p4974_p12 = scmp.lt.s32.totalorder %s4965_s9, %s4965_s9 }
  0x5a   : > { %p4968_p9 = pnand %p4966_p8, %p5151_p7  ;;  %p4975_p2 = por %p4974_p12, %p4973_p11 }
  0x5c   : > { %p4969_p10 = pneg %p4968_p9 }
  0x5e   : > { %p4976_p3 = pnand %p4975_p2, %p4969_p10 }
  0x60   : > { %4979 = shalt.err (!%p4976_p3)
}
  0x61   : > { %4822 = dma.hbm_to_vmem [thread:$0]  (!%p5135_p5), %s5517_s3, 128, %s244_s12, [#allocation5]  }
  0x62   : > { %s5066_s13 = smov [#allocation9]   ;;  %s5067_s30 = smov [#allocation10]  }
  0x63   : > { %s266_s14 = sshll.u32 %s5066_s13, 4  ;;  %s279_s15 = sshll.u32 %s5067_s30, 4  ;;  %s267_s14 = int_to_ptr.vmem [resolvable:$true] %s266_s14  ;;  %s280_s15 = int_to_ptr.vmem [resolvable:$true] %s279_s15 }
  0x64   : > { %s4980_s28 = scalar_lea.hbm %s5519_s5, 2304 }
  0x65   : > { %p4981_p2 = scmp.ne.s32.totalorder %s5519_s5, %s4980_s28  ;;  %p4987_p0 = scmp.lt.u32.totalorder %s4980_s28, %s5519_s5 }
  0x67   : > { %p4983_p3 = pnand %p4981_p2, %p5151_p7 }
  0x69   : > { %p4984_p13 = pneg %p4983_p3 }
  0x6b   : > { %p4989_p1 = pnand %p4987_p0, %p4984_p13 }
  0x6d   : > { %4992 = shalt.err (!%p4989_p1)
}
  0x6e   : > { %s4993_s12 = scalar_lea.vmem %s267_s14, 2304  ;;  %p5001_p9 = scmp.lt.s32.totalorder %s267_s14, %s267_s14 }
  0x6f   : > { %p4994_p4 = scmp.ne.s32.totalorder %s267_s14, %s4993_s12  ;;  %p5002_p10 = scmp.lt.s32.totalorder %s4993_s12, %s4993_s12 }
  0x71   : > { %p4996_p6 = pnand %p4994_p4, %p5151_p7  ;;  %p5003_p11 = por %p5002_p10, %p5001_p9 }
  0x73   : > { %p4997_p8 = pneg %p4996_p6 }
  0x75   : > { %p5004_p12 = pnand %p5003_p11, %p4997_p8 }
  0x77   : > { %5007 = shalt.err (!%p5004_p12)
}
  0x78   : > { %4828 = dma.hbm_to_vmem [thread:$0]  (!%p5135_p5), %s5519_s5, 2304, %s267_s14, [#allocation8], %s5064_s22, %s5064_s22, %s5065_s23  }
  0x79   : > { %s5008_s13 = scalar_lea.hbm %s5520_s6, 256 }
  0x7a   : > { %p5009_p2 = scmp.ne.s32.totalorder %s5520_s6, %s5008_s13  ;;  %p5015_p0 = scmp.lt.u32.totalorder %s5008_s13, %s5520_s6 }
  0x7c   : > { %p5011_p3 = pnand %p5009_p2, %p5151_p7 }
  0x7e   : > { %p5012_p13 = pneg %p5011_p3 }
  0x80   : > { %p5017_p1 = pnand %p5015_p0, %p5012_p13 }
  0x82   : > { %5020 = shalt.err (!%p5017_p1)
}
  0x83   : > { %s5021_s19 = scalar_lea.vmem %s280_s15, 256  ;;  %p5029_p9 = scmp.lt.s32.totalorder %s280_s15, %s280_s15 }
  0x84   : > { %p5022_p4 = scmp.ne.s32.totalorder %s280_s15, %s5021_s19  ;;  %p5030_p10 = scmp.lt.s32.totalorder %s5021_s19, %s5021_s19 }
  0x86   : > { %p5024_p6 = pnand %p5022_p4, %p5151_p7  ;;  %p5031_p11 = por %p5030_p10, %p5029_p9 }
  0x88   : > { %p5025_p8 = pneg %p5024_p6 }
  0x8a   : > { %p5032_p12 = pnand %p5031_p11, %p5025_p8 }
  0x8c   : > { %5035 = shalt.err (!%p5032_p12)
}
  0x8d   : > { %4831 = dma.hbm_to_vmem [thread:$0]  (!%p5135_p5), %s5520_s6, 256, %s280_s15, [#allocation11], %s5064_s22, %s5064_s22, %s5065_s23  }
  0x8e   : > { %p5527_p2 = scmp.ne.s32.totalorder %s5524_s26, 0 }
  0x8f   : > { %p5528_p7 = scmp.eq.s32.totalorder (!%p5527_p2), %s5118_s25, 0 }
  0x90   : > { %303 = sbr.rel (%p5527_p2) target bundleno = 3321 (0xcf9), region = 48 }
  0x97   : > { %5041 = dma.done.wait (%p5528_p7), [#allocation3], 36864   ;;  %p5529_p3 = pmov %p5528_p7 }
  0x99   : > { %5043 = vsyncadd (%p5529_p3), [#allocation3], 4294930432  ;;  %p5530_p13 = pmov %p5529_p3 }
  0x9a   : > { %p5531_p0 = pmov %p5529_p3 }
  0x9b   : > { %5045 = dma.done.wait (%p5530_p13), [#allocation5], 1280  }
  0x9c   : > { %5047 = vsyncadd (%p5531_p0), [#allocation5], 4294966016  ;;  %p5532_p1 = pmov %p5531_p0 }
  0x9d   : > { %p5533_p5 = pmov %p5531_p0 }
  0x9e   : > { %5049 = dma.done.wait (%p5532_p1), [#allocation8], 10368  }
  0x9f   : > { %5051 = vsyncadd (%p5533_p5), [#allocation8], 4294956928  ;;  %p5534_p4 = pmov %p5531_p0 }
  0xa0   : > { %p5535_p6 = pmov %p5531_p0 }
  0xa1   : > { %5053 = dma.done.wait (%p5534_p4), [#allocation11], 256  }
  0xa2   : > { %5055 = vsyncadd (%p5535_p6), [#allocation11], 4294967040  ;;  %v489_v0 = vld [vmem:[#allocation2 + $0x180] sm:$0xff]  ;;  %v490_v1 = vld [vmem:[#allocation2 + $0x188] sm:$0xff]  ;;  %p355_p8 = scmp.lt.s32.totalorder %s5118_s25, 1  ;;  %vm5069_vm0 = vmmov 0  }
  0xa3   : > { %v473_v2 = vld [vmem:[#allocation2 + $0x100] sm:$0xff]  ;;  %v4436_v3 = vpack.c.bf16 %v490_v1, %v489_v0  ;;  %v474_v4 = vld [vmem:[#allocation2 + $0x108] sm:$0xff]  ;;  %v491_v11 = vld [vmem:[#allocation2 + $0x190] sm:$0xff]  ;;  %vm581_vm1 = vcmask 1043456   ;;  %vm577_vm2 = vcmask 31744   ;;  %vm2024_vm3 = vcmask 1040384  }
  0xa4   : > { %v382_v5 = vld [vmem:[#allocation2 + $0x80] sm:$0xff]  ;;  %v383_v6 = vld [vmem:[#allocation2 + $0x88] sm:$0xff]  ;;  %v4438_v7 = vpack.c.bf16 %v474_v4, %v473_v2  ;;  %v492_v13 = vld [vmem:[#allocation2 + $0x198] sm:$0xff]  ;;  %s5537_s25 = smov (!%p355_p8, %s5118_s25), 1  ;;  %vm2020_vm4 = vcmask 400384   ;;  %vm2184_vm5 = vcmask 64512  }
  0xa5   : > { %v4404_v8 = vpack.c.bf16 %v383_v6, %v382_v5  ;;  %v366_v9 = vld [vmem:[#allocation2] sm:$0xff]  ;;  %v367_v10 = vld [vmem:[#allocation2 + $0x8] sm:$0xff]  ;;  %4437 = vmatprep.subr.bf16.mxu1 %v4436_v3  ;;  %v475_v14 = vld [vmem:[#allocation2 + $0x110] sm:$0xff]  ;;  %v4440_v16 = vpack.c.bf16 %v492_v13, %v491_v11  ;;  %s3727_s26 = sshll.u32 %s5537_s25, 3  ;;  %s3728_s23 = sshll.u32 %s5537_s25, 4  ;;  %vm3532_vm6 = vcmask 72704  }
  0xa6   : > { %v4406_v12 = vpack.c.bf16 %v367_v10, %v366_v9  ;;  %v476_v15 = vld [vmem:[#allocation2 + $0x118] sm:$0xff]  ;;  %4439 = vmatpush3.bf16.msra.mxu1 %v4438_v7  ;;  %v384_v18 = vld [vmem:[#allocation2 + $0x90] sm:$0xff]  ;;  %v493_v23 = vld [vmem:[#allocation2 + $0x1a0] sm:$0xff]  ;;  %s5316_s22 = scalar_lea.vmem %s5514_s0, %s3727_s26  ;;  %s364_s27 = scalar_lea.vmem %s5521_s7, %s3728_s23 }
  0xa7   : > { %4405 = vmatprep.subr.bf16.mxu0 %v4404_v8  ;;  %v4442_v17 = vpack.c.bf16 %v476_v15, %v475_v14  ;;  %v385_v19 = vld [vmem:[#allocation2 + $0x98] sm:$0xff]  ;;  %v368_v20 = vld [vmem:[#allocation2 + $0x10] sm:$0xff]  ;;  %v494_v24 = vld [vmem:[#allocation2 + $0x1a8] sm:$0xff]  ;;  %4441 = vmatprep.subr.bf16.mxu1 %v4440_v16 }
  0xa8   : > { %4407 = vmatpush3.bf16.msra.mxu0 %v4406_v12  ;;  %v4408_v21 = vpack.c.bf16 %v385_v19, %v384_v18  ;;  %v369_v22 = vld [vmem:[#allocation2 + $0x18] sm:$0xff]  ;;  %v4444_v26 = vpack.c.bf16 %v494_v24, %v493_v23  ;;  %v477_v27 = vld [vmem:[#allocation2 + $0x120] sm:$0xff]  ;;  %v478_v28 = vld [vmem:[#allocation2 + $0x128] sm:$0xff] }
  0xa9   : > { %v4410_v25 = vpack.c.bf16 %v369_v22, %v368_v20  ;;  %v386_v29 = vld [vmem:[#allocation2 + $0xa0] sm:$0xff]  ;;  %v387_v30 = vld [vmem:[#allocation2 + $0xa8] sm:$0xff]  ;;  %v4446_v33 = vpack.c.bf16 %v478_v28, %v477_v27  ;;  %v495_v35 = vld [vmem:[#allocation2 + $0x1b0] sm:$0xff] }
  0xaa   : > { %4409 = vmatprep.subr.bf16.mxu0 %v4408_v21  ;;  %v370_v31 = vld [vmem:[#allocation2 + $0x20] sm:$0xff]  ;;  %v371_v32 = vld [vmem:[#allocation2 + $0x28] sm:$0xff]  ;;  %4443 = vmatpush3.bf16.msra.mxu1 %v4442_v17  ;;  %v4412_v34 = vpack.c.bf16 %v387_v30, %v386_v29  ;;  %v496_v36 = vld [vmem:[#allocation2 + $0x1b8] sm:$0xff] }
  0xab   : > { %v479_v37 = vld [vmem:[#allocation2 + $0x130] sm:$0xff]  ;;  %4445 = vmatprep.subr.bf16.mxu1 %v4444_v26  ;;  %v4414_v38 = vpack.c.bf16 %v371_v32, %v370_v31  ;;  %v4448_v39 = vpack.c.bf16 %v496_v36, %v495_v35  ;;  %v480_v40 = vld [vmem:[#allocation2 + $0x138] sm:$0xff]  ;;  %v497_v46 = vld [vmem:[#allocation2 + $0x1c0] sm:$0xff] }
  0xac   : > { %4411 = vmatpush3.bf16.msra.mxu0 %v4410_v25  ;;  %v388_v41 = vld [vmem:[#allocation2 + $0xb0] sm:$0xff]  ;;  %v389_v42 = vld [vmem:[#allocation2 + $0xb8] sm:$0xff]  ;;  %v498_v47 = vld [vmem:[#allocation2 + $0x1c8] sm:$0xff]  ;;  %v4450_v48 = vpack.c.bf16 %v480_v40, %v479_v37 }
  0xad   : > { %4413 = vmatprep.subr.bf16.mxu0 %v4412_v34  ;;  %v4416_v43 = vpack.c.bf16 %v389_v42, %v388_v41  ;;  %v372_v44 = vld [vmem:[#allocation2 + $0x30] sm:$0xff]  ;;  %v373_v45 = vld [vmem:[#allocation2 + $0x38] sm:$0xff]  ;;  %v390_v49 = vld [vmem:[#allocation2 + $0xc0] sm:$0xff]  ;;  %v4452_v52 = vpack.c.bf16 %v498_v47, %v497_v46  ;;  %v5068_v34 = vmov 0.0  }
  0xae   : > { %4447 = vmatpush3.bf16.msra.mxu1 %v4446_v33  ;;  %v391_v50 = vld [vmem:[#allocation2 + $0xc8] sm:$0xff]  ;;  %v4418_v51 = vpack.c.bf16 %v373_v45, %v372_v44  ;;  %v481_v53 = vld [vmem:[#allocation2 + $0x140] sm:$0xff]  ;;  %v499_v58 = vld [vmem:[#allocation2 + $0x1d0] sm:$0xff] }
  0xaf   : > { %4449 = vmatprep.subr.bf16.mxu1 %v4448_v39  ;;  %v482_v54 = vld [vmem:[#allocation2 + $0x148] sm:$0xff]  ;;  %v374_v55 = vld [vmem:[#allocation2 + $0x40] sm:$0xff]  ;;  %v4420_v56 = vpack.c.bf16 %v391_v50, %v390_v49  ;;  %v500_v59 = vld [vmem:[#allocation2 + $0x1d8] sm:$0xff] }
  0xb0   : > { %4415 = vmatpush3.bf16.msra.mxu0 %v4414_v38  ;;  %v375_v57 = vld [vmem:[#allocation2 + $0x48] sm:$0xff]  ;;  %v392_v60 = vld [vmem:[#allocation2 + $0xd0] sm:$0xff]  ;;  %v393_v61 = vld [vmem:[#allocation2 + $0xd8] sm:$0xff]  ;;  %v4454_v62 = vpack.c.bf16 %v482_v54, %v481_v53  ;;  %v4456_v0 = vpack.c.bf16 %v500_v59, %v499_v58 }
  0xb1   : > { %4417 = vmatprep.subr.bf16.mxu0 %v4416_v43  ;;  %v4422_v63 = vpack.c.bf16 %v375_v57, %v374_v55  ;;  %v483_v1 = vld [vmem:[#allocation2 + $0x150] sm:$0xff]  ;;  %v484_v2 = vld [vmem:[#allocation2 + $0x158] sm:$0xff]  ;;  %v4424_v4 = vpack.c.bf16 %v393_v61, %v392_v60  ;;  %v501_v6 = vld [vmem:[#allocation2 + $0x1e0] sm:$0xff] }
  0xb2   : > { %4451 = vmatpush3.bf16.msra.mxu1 %v4450_v48  ;;  %v376_v3 = vld [vmem:[#allocation2 + $0x50] sm:$0xff]  ;;  %v377_v5 = vld [vmem:[#allocation2 + $0x58] sm:$0xff]  ;;  %v502_v7 = vld [vmem:[#allocation2 + $0x1e8] sm:$0xff]  ;;  %v4458_v10 = vpack.c.bf16 %v484_v2, %v483_v1 }
  0xb3   : > { %4453 = vmatprep.subr.bf16.mxu1 %v4452_v52  ;;  %v394_v8 = vld [vmem:[#allocation2 + $0xe0] sm:$0xff]  ;;  %v395_v9 = vld [vmem:[#allocation2 + $0xe8] sm:$0xff]  ;;  %v4426_v12 = vpack.c.bf16 %v377_v5, %v376_v3  ;;  %v4460_v13 = vpack.c.bf16 %v502_v7, %v501_v6  ;;  %v503_v19 = vld [vmem:[#allocation2 + $0x1f0] sm:$0xff] }
  0xb4   : > { %4419 = vmatpush3.bf16.msra.mxu0 %v4418_v51  ;;  %v485_v11 = vld [vmem:[#allocation2 + $0x160] sm:$0xff]  ;;  %v486_v14 = vld [vmem:[#allocation2 + $0x168] sm:$0xff]  ;;  %v4428_v17 = vpack.c.bf16 %v395_v9, %v394_v8  ;;  %v504_v20 = vld [vmem:[#allocation2 + $0x1f8] sm:$0xff] }
  0xb5   : > { %4421 = vmatprep.subr.bf16.mxu0 %v4420_v56  ;;  %v378_v15 = vld [vmem:[#allocation2 + $0x60] sm:$0xff]  ;;  %v379_v18 = vld [vmem:[#allocation2 + $0x68] sm:$0xff]  ;;  %v396_v22 = vld [vmem:[#allocation2 + $0xf0] sm:$0xff]  ;;  %v4462_v24 = vpack.c.bf16 %v486_v14, %v485_v11  ;;  %v4464_v26 = vpack.c.bf16 %v504_v20, %v503_v19 }
  0xb6   : > { %4455 = vmatpush3.bf16.msra.mxu1 %v4454_v62  ;;  %v5319_v16 = vld [vmem:[%s5316_s22] sm:$0xff]  ;;  %v397_v23 = vld [vmem:[#allocation2 + $0xf8] sm:$0xff]  ;;  %v4430_v25 = vpack.c.bf16 %v379_v18, %v378_v15  ;;  %v487_v27 = vld [vmem:[#allocation2 + $0x170] sm:$0xff] }
  0xb7   : > { %4457 = vmatprep.subr.bf16.mxu1 %v4456_v0  ;;  %v5323_v21 = vcombine.high %v5319_v16, %v5319_v16  ;;  %v488_v28 = vld [vmem:[#allocation2 + $0x178] sm:$0xff]  ;;  %v4432_v29 = vpack.c.bf16 %v397_v23, %v396_v22  ;;  %v380_v30 = vld [vmem:[#allocation2 + $0x70] sm:$0xff]  ;;  %v748_v36 = vld [vmem:[#allocation2 + $0x280] sm:$0xff] }
  0xb8   : > { %4423 = vmatpush3.bf16.msra.mxu0 %v4422_v63  ;;  %v381_v31 = vld [vmem:[#allocation2 + $0x78] sm:$0xff]  ;;  %v4466_v32 = vpack.c.bf16 %v488_v28, %v487_v27  ;;  %v749_v37 = vld [vmem:[#allocation2 + $0x288] sm:$0xff]  ;;  %v732_v45 = vld [vmem:[#allocation2 + $0x200] sm:$0xff] }
  0xb9   : > { %4425 = vmatprep.subr.bf16.mxu0 %v4424_v4  ;;  %569 = vmatprep.mubr.f32.mxu1 %v5323_v21  ;;  %v4434_v33 = vpack.c.bf16 %v381_v31, %v380_v30  ;;  %v576_v42 = vld [vmem:[#allocation4 + $0x8] sm:$0xff]  ;;  %v4468_v44 = vpack.c.bf16 %v749_v37, %v748_v36  ;;  %v750_v47 = vld [vmem:[#allocation2 + $0x290] sm:$0xff]  ;;  %v751_v48 = vld [vmem:[#allocation2 + $0x298] sm:$0xff] }
  0xba   : > { %4459 = vmatpush3.bf16.msra.mxu1 %v4458_v10  ;;  %465 = vmatprep.mubr.f32.mxu0 %v5323_v21  ;;  %v733_v46 = vld [vmem:[#allocation2 + $0x208] sm:$0xff]  ;;  %v471_v49 = vld [vmem:[#allocation4] sm:$0xff]  ;;  %v4472_v51 = vpack.c.bf16 %v751_v48, %v750_v47  ;;  %v734_v52 = vld [vmem:[#allocation2 + $0x210] sm:$0xff] }
  0xbb   : > { %4461 = vmatprep.subr.bf16.mxu1 %v4460_v13  ;;  %v4470_v50 = vpack.c.bf16 %v733_v46, %v732_v45  ;;  %v735_v53 = vld [vmem:[#allocation2 + $0x218] sm:$0xff]  ;;  %v752_v54 = vld [vmem:[#allocation2 + $0x2a0] sm:$0xff]  ;;  %v753_v55 = vld [vmem:[#allocation2 + $0x2a8] sm:$0xff] }
  0xbc   : > { %4427 = vmatpush3.bf16.msra.mxu0 %v4426_v12  ;;  %v4474_v56 = vpack.c.bf16 %v735_v53, %v734_v52  ;;  %v4476_v57 = vpack.c.bf16 %v753_v55, %v752_v54  ;;  %v736_v58 = vld [vmem:[#allocation2 + $0x220] sm:$0xff]  ;;  %v737_v59 = vld [vmem:[#allocation2 + $0x228] sm:$0xff]  ;;  %v754_v60 = vld [vmem:[#allocation2 + $0x2b0] sm:$0xff] }
  0xbd   : > { %4429 = vmatprep.subr.bf16.mxu0 %v4428_v17  ;;  %v755_v61 = vld [vmem:[#allocation2 + $0x2b8] sm:$0xff]  ;;  %v4478_v62 = vpack.c.bf16 %v737_v59, %v736_v58  ;;  %v738_v0 = vld [vmem:[#allocation2 + $0x230] sm:$0xff]  ;;  %v756_v2 = vld [vmem:[#allocation2 + $0x2c0] sm:$0xff] }
  0xbe   : > { %4463 = vmatpush3.bf16.msra.mxu1 %v4462_v24  ;;  %v4480_v63 = vpack.c.bf16 %v755_v61, %v754_v60  ;;  %v739_v1 = vld [vmem:[#allocation2 + $0x238] sm:$0xff]  ;;  %v757_v3 = vld [vmem:[#allocation2 + $0x2c8] sm:$0xff]  ;;  %v740_v6 = vld [vmem:[#allocation2 + $0x240] sm:$0xff] }
  0xbf   : > { %4465 = vmatprep.subr.bf16.mxu1 %v4464_v26  ;;  %v4482_v4 = vpack.c.bf16 %v739_v1, %v738_v0  ;;  %v4484_v5 = vpack.c.bf16 %v757_v3, %v756_v2  ;;  %v741_v7 = vld [vmem:[#allocation2 + $0x248] sm:$0xff]  ;;  %v758_v8 = vld [vmem:[#allocation2 + $0x2d0] sm:$0xff]  ;;  %v759_v9 = vld [vmem:[#allocation2 + $0x2d8] sm:$0xff] }
  0xc0   : > { %4431 = vmatpush3.bf16.msra.mxu0 %v4430_v25  ;;  %v4486_v10 = vpack.c.bf16 %v741_v7, %v740_v6  ;;  %v4488_v11 = vpack.c.bf16 %v759_v9, %v758_v8  ;;  %v742_v12 = vld [vmem:[#allocation2 + $0x250] sm:$0xff]  ;;  %v743_v13 = vld [vmem:[#allocation2 + $0x258] sm:$0xff]  ;;  %v760_v14 = vld [vmem:[#allocation2 + $0x2e0] sm:$0xff] }
  0xc1   : > { %4433 = vmatprep.subr.bf16.mxu0 %v4432_v29  ;;  %v761_v15 = vld [vmem:[#allocation2 + $0x2e8] sm:$0xff]  ;;  %v4490_v17 = vpack.c.bf16 %v743_v13, %v742_v12  ;;  %v744_v19 = vld [vmem:[#allocation2 + $0x260] sm:$0xff]  ;;  %v762_v22 = vld [vmem:[#allocation2 + $0x2f0] sm:$0xff] }
  0xc2   : > { %4467 = vmatpush3.bf16.msra.mxu1 %v4466_v32  ;;  %v4492_v18 = vpack.c.bf16 %v761_v15, %v760_v14  ;;  %v745_v20 = vld [vmem:[#allocation2 + $0x268] sm:$0xff]  ;;  %v763_v23 = vld [vmem:[#allocation2 + $0x2f8] sm:$0xff]  ;;  %v746_v26 = vld [vmem:[#allocation2 + $0x270] sm:$0xff] }
  0xc3   : > { %4171 = vmatprep.subr.mxu1 %v5068_v34  ;;  %v4494_v24 = vpack.c.bf16 %v745_v20, %v744_v19  ;;  %v4496_v25 = vpack.c.bf16 %v763_v23, %v762_v22  ;;  %v747_v27 = vld [vmem:[#allocation2 + $0x278] sm:$0xff]  ;;  %v931_v36 = vld [vmem:[#allocation2 + $0x388] sm:$0xff]  ;;  %v914_v37 = vld [vmem:[#allocation2 + $0x300] sm:$0xff] }
  0xc4   : > { %4435 = vmatpush3.bf16.msra.mxu0 %v4434_v33  ;;  %v4498_v28 = vpack.c.bf16 %v747_v27, %v746_v26  ;;  %v835_v45 = vld [vmem:[#allocation4 + $0x10] sm:$0xff]  ;;  %v918_v54 = vld [vmem:[#allocation2 + $0x320] sm:$0xff]  ;;  %v919_v55 = vld [vmem:[#allocation2 + $0x328] sm:$0xff] }
  0xc5   : > { %570 = vmatmul.mubr.f32.vlgmr.msra.gmra.mrb[0].mxu1 %v5319_v16  ;;  %4161 = vmatprep.subr.mxu0 %v5068_v34  ;;  %v916_v48 = vld [vmem:[#allocation2 + $0x310] sm:$0xff]  ;;  %v4510_v58 = vpack.c.bf16 %v919_v55, %v918_v54  ;;  %v921_v61 = vld [vmem:[#allocation2 + $0x338] sm:$0xff]  ;;  %v922_v2 = vld [vmem:[#allocation2 + $0x340] sm:$0xff] }
  0xc6   : > { %4173 = vmatprep.mubr.msk.f32.mxu1 %vm5069_vm0, %v5068_v34  ;;  %v920_v60 = vld [vmem:[#allocation2 + $0x330] sm:$0xff]  ;;  %v923_v3 = vld [vmem:[#allocation2 + $0x348] sm:$0xff]  ;;  %v925_v9 = vld [vmem:[#allocation2 + $0x358] sm:$0xff] }
  0xc7   : > { %466 = vmatmul.mubr.f32.vlgmr.msra.gmra.mrb[0].mxu0 %v5319_v16  ;;  %v4514_v0 = vpack.c.bf16 %v921_v61, %v920_v60  ;;  %v4518_v6 = vpack.c.bf16 %v923_v3, %v922_v2  ;;  %v924_v8 = vld [vmem:[#allocation2 + $0x350] sm:$0xff]  ;;  %v926_v14 = vld [vmem:[#allocation2 + $0x360] sm:$0xff]  ;;  %v927_v15 = vld [vmem:[#allocation2 + $0x368] sm:$0xff] }
  0xc8   : > { %4163 = vmatprep.mubr.msk.f32.mxu0 %vm5069_vm0, %v5068_v34  ;;  %v4522_v12 = vpack.c.bf16 %v925_v9, %v924_v8  ;;  %v4526_v19 = vpack.c.bf16 %v927_v15, %v926_v14  ;;  %v928_v22 = vld [vmem:[#allocation2 + $0x370] sm:$0xff]  ;;  %v929_v23 = vld [vmem:[#allocation2 + $0x378] sm:$0xff]  ;;  %v1104_v60 = vld [vmem:[#allocation2 + $0x440] sm:$0xff] }
  0xc9   : > { %v1102_v54 = vld [vmem:[#allocation2 + $0x430] sm:$0xff]  ;;  %v1103_v55 = vld [vmem:[#allocation2 + $0x438] sm:$0xff]  ;;  %v1105_v61 = vld [vmem:[#allocation2 + $0x448] sm:$0xff] }
  0xca   : > { %v1106_v2 = vld [vmem:[#allocation2 + $0x450] sm:$0xff]  ;;  %v1107_v3 = vld [vmem:[#allocation2 + $0x458] sm:$0xff]  ;;  %v1108_v8 = vld [vmem:[#allocation2 + $0x460] sm:$0xff] }
  0xcb   : > { %v1109_v9 = vld [vmem:[#allocation2 + $0x468] sm:$0xff]  ;;  %v1110_v14 = vld [vmem:[#allocation2 + $0x470] sm:$0xff]  ;;  %v1111_v15 = vld [vmem:[#allocation2 + $0x478] sm:$0xff] }
 0x198   : > { %v3796_v35 = vpop.f32.mrb[0].mxu1 }
 0x199   : > { %v3797_v38 = vpop.f32.mrb[1].mxu1 }
 0x19a   : > { %v3761_v39 = vpop.f32.mrb[0].mxu0  ;;  %v3798_v40 = vadd.f32 %v3797_v38, %v3796_v35  ;;  %v930_v35 = vld [vmem:[#allocation2 + $0x380] sm:$0xff]  ;;  %v915_v38 = vld [vmem:[#allocation2 + $0x308] sm:$0xff] }
 0x19b   : > { %v3762_v41 = vpop.f32.mrb[1].mxu0  ;;  %v4502_v46 = vpack.c.bf16 %v915_v38, %v914_v37 }
 0x19c   : > { %v3763_v43 = vadd.f32 %v3762_v41, %v3761_v39  ;;  %4162 = vmatpush3.msk.msra.mxu0 %vm581_vm1, %v3798_v40  ;;  %v932_v40 = vld [vmem:[#allocation2 + $0x390] sm:$0xff]  ;;  %v933_v41 = vld [vmem:[#allocation2 + $0x398] sm:$0xff] }
 0x19d   : > { %4164 = vmatmul.mubr.msk.f32.vlgmr.msra.gmra.mrb[2].mxu0 %vm577_vm2, %v576_v42  ;;  %4166 = vmatprep.subr.mxu0 %v5068_v34  ;;  %v4504_v47 = vpack.c.bf16 %v933_v41, %v932_v40  ;;  %v1017_v40 = vld [vmem:[#allocation4 + $0x18] sm:$0xff] }
 0x19e   : > { %4167 = vmatpush3.msk.msra.mxu0 %vm581_vm1, %v3763_v43  ;;  %4168 = vmatprep.mubr.msk.f32.mxu0 %vm5069_vm0, %v5068_v34  ;;  %v4500_v43 = vpack.c.bf16 %v931_v36, %v930_v35  ;;  %v1114_v35 = vld [vmem:[#allocation2 + $0x490] sm:$0xff]  ;;  %v1115_v36 = vld [vmem:[#allocation2 + $0x498] sm:$0xff] }
 0x19f   : > { %4469 = vmatprep.subr.bf16.mxu0 %v4468_v44 }
 0x1a1   : > { %4169 = vmatmul.mubr.msk.f32.vlgmr.msra.gmra.mrb[4].mxu0 %vm577_vm2, %v471_v49  ;;  %v917_v49 = vld [vmem:[#allocation2 + $0x318] sm:$0xff] }
 0x1a2   : > { %4471 = vmatpush3.bf16.msra.mxu0 %v4470_v50  ;;  %828 = vmatprep.mubr.f32.mxu0 %v5323_v21  ;;  %v934_v50 = vld [vmem:[#allocation2 + $0x3a0] sm:$0xff]  ;;  %v4506_v52 = vpack.c.bf16 %v917_v49, %v916_v48  ;;  %v1101_v49 = vld [vmem:[#allocation2 + $0x428] sm:$0xff] }
 0x1a3   : > { %4473 = vmatprep.subr.bf16.mxu0 %v4472_v51  ;;  %v935_v51 = vld [vmem:[#allocation2 + $0x3a8] sm:$0xff]  ;;  %v1100_v48 = vld [vmem:[#allocation2 + $0x420] sm:$0xff] }
 0x1a4   : > { %v4508_v53 = vpack.c.bf16 %v935_v51, %v934_v50  ;;  %v1118_v50 = vld [vmem:[#allocation2 + $0x4b0] sm:$0xff]  ;;  %v1119_v51 = vld [vmem:[#allocation2 + $0x4b8] sm:$0xff] }
 0x1a6   : > { %4475 = vmatpush3.bf16.msra.mxu0 %v4474_v56  ;;  %v936_v56 = vld [vmem:[#allocation2 + $0x3b0] sm:$0xff] }
 0x1a7   : > { %4477 = vmatprep.subr.bf16.mxu0 %v4476_v57  ;;  %v937_v57 = vld [vmem:[#allocation2 + $0x3b8] sm:$0xff] }
 0x1a8   : > { %v4512_v59 = vpack.c.bf16 %v937_v57, %v936_v56  ;;  %v1120_v56 = vld [vmem:[#allocation2 + $0x4c0] sm:$0xff]  ;;  %v1121_v57 = vld [vmem:[#allocation2 + $0x4c8] sm:$0xff] }
 0x1aa   : > { %4479 = vmatpush3.bf16.msra.mxu0 %v4478_v62  ;;  %v938_v62 = vld [vmem:[#allocation2 + $0x3c0] sm:$0xff] }
 0x1ab   : > { %4481 = vmatprep.subr.bf16.mxu0 %v4480_v63  ;;  %v939_v63 = vld [vmem:[#allocation2 + $0x3c8] sm:$0xff] }
 0x1ac   : > { %v4516_v1 = vpack.c.bf16 %v939_v63, %v938_v62  ;;  %v1122_v62 = vld [vmem:[#allocation2 + $0x4d0] sm:$0xff]  ;;  %v1123_v63 = vld [vmem:[#allocation2 + $0x4d8] sm:$0xff] }
 0x1ae   : > { %4483 = vmatpush3.bf16.msra.mxu0 %v4482_v4  ;;  %v940_v4 = vld [vmem:[#allocation2 + $0x3d0] sm:$0xff] }
 0x1af   : > { %4485 = vmatprep.subr.bf16.mxu0 %v4484_v5  ;;  %v941_v5 = vld [vmem:[#allocation2 + $0x3d8] sm:$0xff] }
 0x1b0   : > { %v4520_v7 = vpack.c.bf16 %v941_v5, %v940_v4  ;;  %v1124_v4 = vld [vmem:[#allocation2 + $0x4e0] sm:$0xff]  ;;  %v1125_v5 = vld [vmem:[#allocation2 + $0x4e8] sm:$0xff] }
 0x1b2   : > { %4487 = vmatpush3.bf16.msra.mxu0 %v4486_v10  ;;  %v942_v10 = vld [vmem:[#allocation2 + $0x3e0] sm:$0xff] }
 0x1b3   : > { %4489 = vmatprep.subr.bf16.mxu0 %v4488_v11  ;;  %v943_v11 = vld [vmem:[#allocation2 + $0x3e8] sm:$0xff] }
 0x1b4   : > { %v4524_v13 = vpack.c.bf16 %v943_v11, %v942_v10  ;;  %v1126_v10 = vld [vmem:[#allocation2 + $0x4f0] sm:$0xff]  ;;  %v1127_v11 = vld [vmem:[#allocation2 + $0x4f8] sm:$0xff] }
 0x1b6   : > { %4491 = vmatpush3.bf16.msra.mxu0 %v4490_v17  ;;  %v944_v17 = vld [vmem:[#allocation2 + $0x3f0] sm:$0xff] }
 0x1b7   : > { %4493 = vmatprep.subr.bf16.mxu0 %v4492_v18  ;;  %v945_v18 = vld [vmem:[#allocation2 + $0x3f8] sm:$0xff] }
 0x1b8   : > { %v4528_v20 = vpack.c.bf16 %v945_v18, %v944_v17  ;;  %v4562_v17 = vpack.c.bf16 %v1111_v15, %v1110_v14  ;;  %v1476_v14 = vld [vmem:[#allocation2 + $0x680] sm:$0xff]  ;;  %v1477_v15 = vld [vmem:[#allocation2 + $0x688] sm:$0xff] }
 0x1ba   : > { %4495 = vmatpush3.bf16.msra.mxu0 %v4494_v24  ;;  %v4530_v24 = vpack.c.bf16 %v929_v23, %v928_v22  ;;  %v1294_v22 = vld [vmem:[#allocation2 + $0x580] sm:$0xff]  ;;  %v1295_v23 = vld [vmem:[#allocation2 + $0x588] sm:$0xff] }
 0x1bb   : > { %4497 = vmatprep.subr.bf16.mxu0 %v4496_v25 }
 0x1be   : > { %4499 = vmatpush3.bf16.msra.mxu0 %v4498_v28  ;;  %v1112_v28 = vld [vmem:[#allocation2 + $0x480] sm:$0xff] }
 0x1bf   : > { %4176 = vmatprep.subr.mxu0 %v5068_v34 }
 0x1c1   : > { %829 = vmatmul.mubr.f32.vlgmr.msra.gmra.mrb[6].mxu0 %v5319_v16 }
 0x1c2   : > { %4178 = vmatprep.mubr.msk.f32.mxu0 %vm5069_vm0, %v5068_v34 }
 0x270   : > { %v651_v29 = vpop.f32.mrb[2].mxu0 }
 0x271   : > { %v4165_v30 = vpop.f32.mrb[3].mxu0 }
 0x272   : > { %v1096_v30 = vld [vmem:[#allocation2 + $0x400] sm:$0xff] }
 0x274   : > { %v727_v31 = vpop.f32.mrb[4].mxu0 }
 0x275   : > { %v5347_v32 = vadd.f32 %v727_v31, %v651_v29  ;;  %v4170_v33 = vpop.f32.mrb[5].mxu0  ;;  %v1113_v29 = vld [vmem:[#allocation2 + $0x488] sm:$0xff] }
 0x276   : > { %v1097_v31 = vld [vmem:[#allocation2 + $0x408] sm:$0xff]  ;;  %v4532_v38 = vpack.c.bf16 %v1113_v29, %v1112_v28  ;;  %v1296_v28 = vld [vmem:[#allocation2 + $0x590] sm:$0xff]  ;;  %v1297_v29 = vld [vmem:[#allocation2 + $0x598] sm:$0xff] }
 0x277   : > { %v4534_v41 = vpack.c.bf16 %v1097_v31, %v1096_v30  ;;  %v4564_v31 = vpack.c.bf16 %v1295_v23, %v1294_v22  ;;  %v1478_v22 = vld [vmem:[#allocation2 + $0x690] sm:$0xff]  ;;  %v1479_v23 = vld [vmem:[#allocation2 + $0x698] sm:$0xff] }
 0x294   : > { %v3835_v39 = vpop.f32.mrb[6].mxu0 }
 0x295   : > { %v3836_v42 = vpop.f32.mrb[7].mxu0 }
 0x296   : > { %v3837_v44 = vadd.f32 %v3836_v42, %v3835_v39  ;;  %v4536_v42 = vpack.c.bf16 %v1115_v36, %v1114_v35  ;;  %v1199_v35 = vld [vmem:[#allocation4 + $0x20] sm:$0xff] }
 0x298   : > { %4172 = vmatpush3.msk.msra.mxu1 %vm581_vm1, %v3837_v44  ;;  %v1099_v44 = vld [vmem:[#allocation2 + $0x418] sm:$0xff] }
 0x299   : > { %4174 = vmatmul.mubr.msk.f32.vlgmr.msra.gmra.mrb[2].mxu1 %vm577_vm2, %v835_v45  ;;  %4501 = vmatprep.subr.bf16.mxu1 %v4500_v43  ;;  %v1098_v43 = vld [vmem:[#allocation2 + $0x410] sm:$0xff]  ;;  %v1117_v45 = vld [vmem:[#allocation2 + $0x4a8] sm:$0xff] }
 0x29a   : > { %4503 = vmatpush3.bf16.msra.mxu1 %v4502_v46  ;;  %1010 = vmatprep.mubr.f32.mxu1 %v5323_v21  ;;  %v4538_v46 = vpack.c.bf16 %v1099_v44, %v1098_v43  ;;  %v1282_v43 = vld [vmem:[#allocation2 + $0x520] sm:$0xff]  ;;  %v1283_v44 = vld [vmem:[#allocation2 + $0x528] sm:$0xff] }
 0x29b   : > { %4505 = vmatprep.subr.bf16.mxu1 %v4504_v47 }
 0x29e   : > { %4507 = vmatpush3.bf16.msra.mxu1 %v4506_v52  ;;  %v4542_v52 = vpack.c.bf16 %v1101_v49, %v1100_v48  ;;  %v1284_v48 = vld [vmem:[#allocation2 + $0x530] sm:$0xff]  ;;  %v1285_v49 = vld [vmem:[#allocation2 + $0x538] sm:$0xff] }
 0x29f   : > { %4509 = vmatprep.subr.bf16.mxu1 %v4508_v53  ;;  %v4544_v53 = vpack.c.bf16 %v1119_v51, %v1118_v50  ;;  %v1302_v50 = vld [vmem:[#allocation2 + $0x5c0] sm:$0xff]  ;;  %v1303_v51 = vld [vmem:[#allocation2 + $0x5c8] sm:$0xff] }
 0x2a2   : > { %4511 = vmatpush3.bf16.msra.mxu1 %v4510_v58  ;;  %v4546_v58 = vpack.c.bf16 %v1103_v55, %v1102_v54  ;;  %v1286_v54 = vld [vmem:[#allocation2 + $0x540] sm:$0xff]  ;;  %v1287_v55 = vld [vmem:[#allocation2 + $0x548] sm:$0xff] }
 0x2a3   : > { %4513 = vmatprep.subr.bf16.mxu1 %v4512_v59  ;;  %v4548_v59 = vpack.c.bf16 %v1121_v57, %v1120_v56  ;;  %v1304_v56 = vld [vmem:[#allocation2 + $0x5d0] sm:$0xff]  ;;  %v1305_v57 = vld [vmem:[#allocation2 + $0x5d8] sm:$0xff] }
 0x2a6   : > { %4515 = vmatpush3.bf16.msra.mxu1 %v4514_v0  ;;  %v4550_v0 = vpack.c.bf16 %v1105_v61, %v1104_v60  ;;  %v1288_v60 = vld [vmem:[#allocation2 + $0x550] sm:$0xff]  ;;  %v1289_v61 = vld [vmem:[#allocation2 + $0x558] sm:$0xff] }
 0x2a7   : > { %4517 = vmatprep.subr.bf16.mxu1 %v4516_v1  ;;  %v4552_v1 = vpack.c.bf16 %v1123_v63, %v1122_v62  ;;  %v1306_v62 = vld [vmem:[#allocation2 + $0x5e0] sm:$0xff]  ;;  %v1307_v63 = vld [vmem:[#allocation2 + $0x5e8] sm:$0xff] }
 0x2aa   : > { %4519 = vmatpush3.bf16.msra.mxu1 %v4518_v6  ;;  %v4554_v6 = vpack.c.bf16 %v1107_v3, %v1106_v2  ;;  %v1290_v2 = vld [vmem:[#allocation2 + $0x560] sm:$0xff]  ;;  %v1291_v3 = vld [vmem:[#allocation2 + $0x568] sm:$0xff] }
 0x2ab   : > { %4521 = vmatprep.subr.bf16.mxu1 %v4520_v7  ;;  %v4556_v7 = vpack.c.bf16 %v1125_v5, %v1124_v4  ;;  %v1308_v4 = vld [vmem:[#allocation2 + $0x5f0] sm:$0xff]  ;;  %v1309_v5 = vld [vmem:[#allocation2 + $0x5f8] sm:$0xff] }
 0x2ae   : > { %4523 = vmatpush3.bf16.msra.mxu1 %v4522_v12  ;;  %v4558_v12 = vpack.c.bf16 %v1109_v9, %v1108_v8  ;;  %v1292_v8 = vld [vmem:[#allocation2 + $0x570] sm:$0xff]  ;;  %v1293_v9 = vld [vmem:[#allocation2 + $0x578] sm:$0xff] }
 0x2af   : > { %4525 = vmatprep.subr.bf16.mxu1 %v4524_v13  ;;  %v4560_v13 = vpack.c.bf16 %v1127_v11, %v1126_v10  ;;  %v4594_v10 = vpack.c.bf16 %v1293_v9, %v1292_v8  ;;  %v1658_v8 = vld [vmem:[#allocation2 + $0x780] sm:$0xff]  ;;  %v1659_v9 = vld [vmem:[#allocation2 + $0x788] sm:$0xff] }
 0x2b2   : > { %4527 = vmatpush3.bf16.msra.mxu1 %v4526_v19 }
 0x2b3   : > { %4529 = vmatprep.subr.bf16.mxu1 %v4528_v20 }
 0x2b6   : > { %4531 = vmatpush3.bf16.msra.mxu1 %v4530_v24  ;;  %v1278_v24 = vld [vmem:[#allocation2 + $0x500] sm:$0xff] }
 0x2b7   : > { %4181 = vmatprep.subr.mxu1 %v5068_v34 }
 0x2b9   : > { %1011 = vmatmul.mubr.f32.vlgmr.msra.gmra.mrb[4].mxu1 %v5319_v16 }
 0x2ba   : > { %4183 = vmatprep.mubr.msk.f32.mxu1 %vm5069_vm0, %v5068_v34 }
 0x36c   : > { %v908_v25 = vpop.f32.mrb[2].mxu1 }
 0x36d   : > { %v5357_v26 = vadd.f32 %v908_v25, %v5347_v32  ;;  %v4175_v27 = vpop.f32.mrb[3].mxu1  ;;  %v1116_v32 = vld [vmem:[#allocation2 + $0x4a0] sm:$0xff]  ;;  %v1279_v25 = vld [vmem:[#allocation2 + $0x508] sm:$0xff] }
 0x36e   : > { %v4540_v47 = vpack.c.bf16 %v1117_v45, %v1116_v32  ;;  %v4566_v36 = vpack.c.bf16 %v1279_v25, %v1278_v24  ;;  %v1300_v32 = vld [vmem:[#allocation2 + $0x5b0] sm:$0xff]  ;;  %v1301_v45 = vld [vmem:[#allocation2 + $0x5b8] sm:$0xff]  ;;  %v4596_v25 = vpack.c.bf16 %v1477_v15, %v1476_v14 }
 0x36f   : > { %v1660_v14 = vld [vmem:[#allocation2 + $0x790] sm:$0xff]  ;;  %v1661_v15 = vld [vmem:[#allocation2 + $0x798] sm:$0xff] }
 0x38c   : > { %v3872_v33 = vpop.f32.mrb[4].mxu1 }
 0x38d   : > { %v3873_v37 = vpop.f32.mrb[5].mxu1 }
 0x38e   : > { %v3874_v39 = vadd.f32 %v3873_v37, %v3872_v33  ;;  %v4568_v37 = vpack.c.bf16 %v1297_v29, %v1296_v28  ;;  %v1381_v28 = vld [vmem:[#allocation4 + $0x28] sm:$0xff] }
 0x390   : > { %4177 = vmatpush3.msk.msra.mxu0 %vm581_vm1, %v3874_v39  ;;  %v1281_v39 = vld [vmem:[#allocation2 + $0x518] sm:$0xff] }
 0x391   : > { %4179 = vmatmul.mubr.msk.f32.vlgmr.msra.gmra.mrb[8].mxu0 %vm577_vm2, %v1017_v40  ;;  %4533 = vmatprep.subr.bf16.mxu0 %v4532_v38  ;;  %v1280_v38 = vld [vmem:[#allocation2 + $0x510] sm:$0xff]  ;;  %v1299_v40 = vld [vmem:[#allocation2 + $0x5a8] sm:$0xff] }
 0x392   : > { %4535 = vmatpush3.bf16.msra.mxu0 %v4534_v41  ;;  %1192 = vmatprep.mubr.f32.mxu0 %v5323_v21  ;;  %v4570_v41 = vpack.c.bf16 %v1281_v39, %v1280_v38  ;;  %v1464_v38 = vld [vmem:[#allocation2 + $0x620] sm:$0xff]  ;;  %v1465_v39 = vld [vmem:[#allocation2 + $0x628] sm:$0xff] }
 0x393   : > { %4537 = vmatprep.subr.bf16.mxu0 %v4536_v42 }
 0x396   : > { %4539 = vmatpush3.bf16.msra.mxu0 %v4538_v46  ;;  %v4574_v46 = vpack.c.bf16 %v1283_v44, %v1282_v43  ;;  %v1466_v43 = vld [vmem:[#allocation2 + $0x630] sm:$0xff]  ;;  %v1467_v44 = vld [vmem:[#allocation2 + $0x638] sm:$0xff] }
 0x397   : > { %4541 = vmatprep.subr.bf16.mxu0 %v4540_v47  ;;  %v4576_v47 = vpack.c.bf16 %v1301_v45, %v1300_v32  ;;  %v1484_v32 = vld [vmem:[#allocation2 + $0x6c0] sm:$0xff]  ;;  %v1485_v45 = vld [vmem:[#allocation2 + $0x6c8] sm:$0xff] }
 0x39a   : > { %4543 = vmatpush3.bf16.msra.mxu0 %v4542_v52  ;;  %v4578_v52 = vpack.c.bf16 %v1285_v49, %v1284_v48  ;;  %v1468_v48 = vld [vmem:[#allocation2 + $0x640] sm:$0xff]  ;;  %v1469_v49 = vld [vmem:[#allocation2 + $0x648] sm:$0xff] }
 0x39b   : > { %4545 = vmatprep.subr.bf16.mxu0 %v4544_v53  ;;  %v4580_v53 = vpack.c.bf16 %v1303_v51, %v1302_v50  ;;  %v1486_v50 = vld [vmem:[#allocation2 + $0x6d0] sm:$0xff]  ;;  %v1487_v51 = vld [vmem:[#allocation2 + $0x6d8] sm:$0xff] }
 0x39e   : > { %4547 = vmatpush3.bf16.msra.mxu0 %v4546_v58  ;;  %v4582_v58 = vpack.c.bf16 %v1287_v55, %v1286_v54  ;;  %v1470_v54 = vld [vmem:[#allocation2 + $0x650] sm:$0xff]  ;;  %v1471_v55 = vld [vmem:[#allocation2 + $0x658] sm:$0xff] }
 0x39f   : > { %4549 = vmatprep.subr.bf16.mxu0 %v4548_v59  ;;  %v4584_v59 = vpack.c.bf16 %v1305_v57, %v1304_v56  ;;  %v1488_v56 = vld [vmem:[#allocation2 + $0x6e0] sm:$0xff]  ;;  %v1489_v57 = vld [vmem:[#allocation2 + $0x6e8] sm:$0xff] }
 0x3a2   : > { %4551 = vmatpush3.bf16.msra.mxu0 %v4550_v0  ;;  %v4586_v0 = vpack.c.bf16 %v1289_v61, %v1288_v60  ;;  %v1472_v60 = vld [vmem:[#allocation2 + $0x660] sm:$0xff]  ;;  %v1473_v61 = vld [vmem:[#allocation2 + $0x668] sm:$0xff] }
 0x3a3   : > { %4553 = vmatprep.subr.bf16.mxu0 %v4552_v1  ;;  %v4588_v1 = vpack.c.bf16 %v1307_v63, %v1306_v62  ;;  %v1490_v62 = vld [vmem:[#allocation2 + $0x6f0] sm:$0xff]  ;;  %v1491_v63 = vld [vmem:[#allocation2 + $0x6f8] sm:$0xff] }
 0x3a6   : > { %4555 = vmatpush3.bf16.msra.mxu0 %v4554_v6  ;;  %v4590_v6 = vpack.c.bf16 %v1291_v3, %v1290_v2  ;;  %v1474_v2 = vld [vmem:[#allocation2 + $0x670] sm:$0xff]  ;;  %v1475_v3 = vld [vmem:[#allocation2 + $0x678] sm:$0xff] }
 0x3a7   : > { %4557 = vmatprep.subr.bf16.mxu0 %v4556_v7  ;;  %v4592_v7 = vpack.c.bf16 %v1309_v5, %v1308_v4  ;;  %v4626_v4 = vpack.c.bf16 %v1475_v3, %v1474_v2  ;;  %v1840_v2 = vld [vmem:[#allocation2 + $0x880] sm:$0xff]  ;;  %v1841_v3 = vld [vmem:[#allocation2 + $0x888] sm:$0xff] }
 0x3aa   : > { %4559 = vmatpush3.bf16.msra.mxu0 %v4558_v12 }
 0x3ab   : > { %4561 = vmatprep.subr.bf16.mxu0 %v4560_v13 }
 0x3ae   : > { %4563 = vmatpush3.bf16.msra.mxu0 %v4562_v17  ;;  %v1460_v17 = vld [vmem:[#allocation2 + $0x600] sm:$0xff] }
 0x3af   : > { %4186 = vmatprep.subr.mxu0 %v5068_v34 }
 0x3b1   : > { %1193 = vmatmul.mubr.f32.vlgmr.msra.gmra.mrb[10].mxu0 %v5319_v16 }
 0x3b2   : > { %4188 = vmatprep.mubr.msk.f32.mxu0 %vm5069_vm0, %v5068_v34 }
 0x464   : > { %v1090_v18 = vpop.f32.mrb[8].mxu0 }
 0x465   : > { %v5367_v19 = vadd.f32 %v1090_v18, %v5357_v26  ;;  %v4180_v20 = vpop.f32.mrb[9].mxu0  ;;  %v1298_v26 = vld [vmem:[#allocation2 + $0x5a0] sm:$0xff]  ;;  %v1461_v18 = vld [vmem:[#allocation2 + $0x608] sm:$0xff] }
 0x466   : > { %v4572_v42 = vpack.c.bf16 %v1299_v40, %v1298_v26  ;;  %v4598_v29 = vpack.c.bf16 %v1461_v18, %v1460_v17  ;;  %v1482_v26 = vld [vmem:[#allocation2 + $0x6b0] sm:$0xff]  ;;  %v1483_v40 = vld [vmem:[#allocation2 + $0x6b8] sm:$0xff]  ;;  %v4628_v18 = vpack.c.bf16 %v1659_v9, %v1658_v8 }
 0x467   : > { %v1842_v8 = vld [vmem:[#allocation2 + $0x890] sm:$0xff]  ;;  %v1843_v9 = vld [vmem:[#allocation2 + $0x898] sm:$0xff] }
 0x484   : > { %v3909_v27 = vpop.f32.mrb[10].mxu0 }
 0x485   : > { %v3910_v30 = vpop.f32.mrb[11].mxu0 }
 0x486   : > { %v3911_v33 = vadd.f32 %v3910_v30, %v3909_v27  ;;  %v4600_v30 = vpack.c.bf16 %v1479_v23, %v1478_v22  ;;  %v1563_v22 = vld [vmem:[#allocation4 + $0x30] sm:$0xff] }
 0x488   : > { %4182 = vmatpush3.msk.msra.mxu1 %vm581_vm1, %v3911_v33  ;;  %v1463_v33 = vld [vmem:[#allocation2 + $0x618] sm:$0xff] }
 0x489   : > { %4184 = vmatmul.mubr.msk.f32.vlgmr.msra.gmra.mrb[6].mxu1 %vm577_vm2, %v1199_v35  ;;  %4565 = vmatprep.subr.bf16.mxu1 %v4564_v31  ;;  %v1462_v31 = vld [vmem:[#allocation2 + $0x610] sm:$0xff]  ;;  %v1481_v35 = vld [vmem:[#allocation2 + $0x6a8] sm:$0xff] }
 0x48a   : > { %4567 = vmatpush3.bf16.msra.mxu1 %v4566_v36  ;;  %1374 = vmatprep.mubr.f32.mxu1 %v5323_v21  ;;  %v4602_v36 = vpack.c.bf16 %v1463_v33, %v1462_v31  ;;  %v1646_v31 = vld [vmem:[#allocation2 + $0x720] sm:$0xff]  ;;  %v1647_v33 = vld [vmem:[#allocation2 + $0x728] sm:$0xff] }
 0x48b   : > { %4569 = vmatprep.subr.bf16.mxu1 %v4568_v37 }
 0x48e   : > { %4571 = vmatpush3.bf16.msra.mxu1 %v4570_v41  ;;  %v4606_v41 = vpack.c.bf16 %v1465_v39, %v1464_v38  ;;  %v1648_v38 = vld [vmem:[#allocation2 + $0x730] sm:$0xff]  ;;  %v1649_v39 = vld [vmem:[#allocation2 + $0x738] sm:$0xff] }
 0x48f   : > { %4573 = vmatprep.subr.bf16.mxu1 %v4572_v42  ;;  %v4608_v42 = vpack.c.bf16 %v1483_v40, %v1482_v26  ;;  %v1666_v26 = vld [vmem:[#allocation2 + $0x7c0] sm:$0xff]  ;;  %v1667_v40 = vld [vmem:[#allocation2 + $0x7c8] sm:$0xff] }
 0x492   : > { %4575 = vmatpush3.bf16.msra.mxu1 %v4574_v46  ;;  %v4610_v46 = vpack.c.bf16 %v1467_v44, %v1466_v43  ;;  %v1650_v43 = vld [vmem:[#allocation2 + $0x740] sm:$0xff]  ;;  %v1651_v44 = vld [vmem:[#allocation2 + $0x748] sm:$0xff] }
 0x493   : > { %4577 = vmatprep.subr.bf16.mxu1 %v4576_v47  ;;  %v4612_v47 = vpack.c.bf16 %v1485_v45, %v1484_v32  ;;  %v1668_v32 = vld [vmem:[#allocation2 + $0x7d0] sm:$0xff]  ;;  %v1669_v45 = vld [vmem:[#allocation2 + $0x7d8] sm:$0xff] }
 0x496   : > { %4579 = vmatpush3.bf16.msra.mxu1 %v4578_v52  ;;  %v4614_v52 = vpack.c.bf16 %v1469_v49, %v1468_v48  ;;  %v1652_v48 = vld [vmem:[#allocation2 + $0x750] sm:$0xff]  ;;  %v1653_v49 = vld [vmem:[#allocation2 + $0x758] sm:$0xff] }
 0x497   : > { %4581 = vmatprep.subr.bf16.mxu1 %v4580_v53  ;;  %v4616_v53 = vpack.c.bf16 %v1487_v51, %v1486_v50  ;;  %v1670_v50 = vld [vmem:[#allocation2 + $0x7e0] sm:$0xff]  ;;  %v1671_v51 = vld [vmem:[#allocation2 + $0x7e8] sm:$0xff] }
 0x49a   : > { %4583 = vmatpush3.bf16.msra.mxu1 %v4582_v58  ;;  %v4618_v58 = vpack.c.bf16 %v1471_v55, %v1470_v54  ;;  %v1654_v54 = vld [vmem:[#allocation2 + $0x760] sm:$0xff]  ;;  %v1655_v55 = vld [vmem:[#allocation2 + $0x768] sm:$0xff] }
 0x49b   : > { %4585 = vmatprep.subr.bf16.mxu1 %v4584_v59  ;;  %v4620_v59 = vpack.c.bf16 %v1489_v57, %v1488_v56  ;;  %v1672_v56 = vld [vmem:[#allocation2 + $0x7f0] sm:$0xff]  ;;  %v1673_v57 = vld [vmem:[#allocation2 + $0x7f8] sm:$0xff] }
 0x49e   : > { %4587 = vmatpush3.bf16.msra.mxu1 %v4586_v0  ;;  %v4622_v0 = vpack.c.bf16 %v1473_v61, %v1472_v60  ;;  %v1656_v60 = vld [vmem:[#allocation2 + $0x770] sm:$0xff]  ;;  %v1657_v61 = vld [vmem:[#allocation2 + $0x778] sm:$0xff] }
 0x49f   : > { %4589 = vmatprep.subr.bf16.mxu1 %v4588_v1  ;;  %v4624_v1 = vpack.c.bf16 %v1491_v63, %v1490_v62  ;;  %v4658_v62 = vpack.c.bf16 %v1657_v61, %v1656_v60 }
 0x4a2   : > { %4591 = vmatpush3.bf16.msra.mxu1 %v4590_v6 }
 0x4a3   : > { %4593 = vmatprep.subr.bf16.mxu1 %v4592_v7 }
 0x4a6   : > { %4595 = vmatpush3.bf16.msra.mxu1 %v4594_v10  ;;  %v1642_v10 = vld [vmem:[#allocation2 + $0x700] sm:$0xff] }
 0x4a7   : > { %4191 = vmatprep.subr.mxu1 %v5068_v34 }
 0x4a9   : > { %1375 = vmatmul.mubr.f32.vlgmr.msra.gmra.mrb[8].mxu1 %v5319_v16 }
 0x4aa   : > { %4193 = vmatprep.mubr.msk.f32.mxu1 %vm5069_vm0, %v5068_v34 }
 0x55c   : > { %v1272_v11 = vpop.f32.mrb[6].mxu1 }
 0x55d   : > { %v5377_v12 = vadd.f32 %v1272_v11, %v5367_v19  ;;  %v4185_v13 = vpop.f32.mrb[7].mxu1  ;;  %v1480_v19 = vld [vmem:[#allocation2 + $0x6a0] sm:$0xff]  ;;  %v1643_v11 = vld [vmem:[#allocation2 + $0x708] sm:$0xff] }
 0x55e   : > { %v4604_v37 = vpack.c.bf16 %v1481_v35, %v1480_v19  ;;  %v4630_v23 = vpack.c.bf16 %v1643_v11, %v1642_v10  ;;  %v1664_v19 = vld [vmem:[#allocation2 + $0x7b0] sm:$0xff]  ;;  %v1665_v35 = vld [vmem:[#allocation2 + $0x7b8] sm:$0xff]  ;;  %v4660_v11 = vpack.c.bf16 %v1841_v3, %v1840_v2 }
 0x57c   : > { %v3946_v20 = vpop.f32.mrb[8].mxu1 }
 0x57d   : > { %v3947_v24 = vpop.f32.mrb[9].mxu1 }
 0x57e   : > { %v3948_v27 = vadd.f32 %v3947_v24, %v3946_v20  ;;  %v4632_v24 = vpack.c.bf16 %v1661_v15, %v1660_v14  ;;  %v1745_v14 = vld [vmem:[#allocation4 + $0x38] sm:$0xff]  ;;  %v4664_v15 = vpack.c.bf16 %v1843_v9, %v1842_v8  ;;  %v2016_v8 = vld [vmem:[#allocation7 + $0x18] sm:$0xff]  ;;  %v5071_v9 = vmov 0.0|0.0  }
 0x580   : > { %4187 = vmatpush3.msk.msra.mxu0 %vm581_vm1, %v3948_v27  ;;  %v1645_v27 = vld [vmem:[#allocation2 + $0x718] sm:$0xff] }
 0x581   : > { %4189 = vmatmul.mubr.msk.f32.vlgmr.msra.gmra.mrb[12].mxu0 %vm577_vm2, %v1381_v28  ;;  %4597 = vmatprep.subr.bf16.mxu0 %v4596_v25  ;;  %v1644_v25 = vld [vmem:[#allocation2 + $0x710] sm:$0xff]  ;;  %v1663_v28 = vld [vmem:[#allocation2 + $0x7a8] sm:$0xff] }
 0x582   : > { %4599 = vmatpush3.bf16.msra.mxu0 %v4598_v29  ;;  %1556 = vmatprep.mubr.f32.mxu0 %v5323_v21  ;;  %v4634_v29 = vpack.c.bf16 %v1645_v27, %v1644_v25  ;;  %v1829_v25 = vld [vmem:[#allocation2 + $0x828] sm:$0xff]  ;;  %v1846_v27 = vld [vmem:[#allocation2 + $0x8b0] sm:$0xff] }
 0x583   : > { %4601 = vmatprep.subr.bf16.mxu0 %v4600_v30 }
 0x586   : > { %4603 = vmatpush3.bf16.msra.mxu0 %v4602_v36  ;;  %v4638_v36 = vpack.c.bf16 %v1647_v33, %v1646_v31  ;;  %v1831_v31 = vld [vmem:[#allocation2 + $0x838] sm:$0xff]  ;;  %v1848_v33 = vld [vmem:[#allocation2 + $0x8c0] sm:$0xff] }
 0x587   : > { %4605 = vmatprep.subr.bf16.mxu0 %v4604_v37  ;;  %v4640_v37 = vpack.c.bf16 %v1665_v35, %v1664_v19  ;;  %v1849_v19 = vld [vmem:[#allocation2 + $0x8c8] sm:$0xff] }
 0x58a   : > { %4607 = vmatpush3.bf16.msra.mxu0 %v4606_v41  ;;  %v4642_v41 = vpack.c.bf16 %v1649_v39, %v1648_v38  ;;  %v1850_v38 = vld [vmem:[#allocation2 + $0x8d0] sm:$0xff]  ;;  %v1851_v39 = vld [vmem:[#allocation2 + $0x8d8] sm:$0xff] }
 0x58b   : > { %4609 = vmatprep.subr.bf16.mxu0 %v4608_v42  ;;  %v4644_v42 = vpack.c.bf16 %v1667_v40, %v1666_v26  ;;  %v4680_v40 = vpack.c.bf16 %v1851_v39, %v1850_v38  ;;  %v2352_v38 = vld [vmem:[#allocation7 + $0x90] sm:$0xff]  ;;  %v2353_v39 = vld [vmem:[#allocation7 + $0x98] sm:$0xff] }
 0x58e   : > { %4611 = vmatpush3.bf16.msra.mxu0 %v4610_v46  ;;  %v4646_v46 = vpack.c.bf16 %v1651_v44, %v1650_v43  ;;  %v1852_v43 = vld [vmem:[#allocation2 + $0x8e0] sm:$0xff]  ;;  %v1853_v44 = vld [vmem:[#allocation2 + $0x8e8] sm:$0xff] }
 0x58f   : > { %4613 = vmatprep.subr.bf16.mxu0 %v4612_v47  ;;  %v4648_v47 = vpack.c.bf16 %v1669_v45, %v1668_v32  ;;  %v4684_v45 = vpack.c.bf16 %v1853_v44, %v1852_v43  ;;  %v2684_v44 = vld [vmem:[#allocation7 + $0xf0] sm:$0xff] }
 0x592   : > { %4615 = vmatpush3.bf16.msra.mxu0 %v4614_v52  ;;  %v4650_v52 = vpack.c.bf16 %v1653_v49, %v1652_v48  ;;  %v1854_v48 = vld [vmem:[#allocation2 + $0x8f0] sm:$0xff]  ;;  %v1855_v49 = vld [vmem:[#allocation2 + $0x8f8] sm:$0xff] }
 0x593   : > { %4617 = vmatprep.subr.bf16.mxu0 %v4616_v53  ;;  %v4652_v53 = vpack.c.bf16 %v1671_v51, %v1670_v50  ;;  %v4688_v51 = vpack.c.bf16 %v1855_v49, %v1854_v48  ;;  %v2849_v49 = vld [vmem:[#allocation7 + $0x118] sm:$0xff] }
 0x596   : > { %4619 = vmatpush3.bf16.msra.mxu0 %v4618_v58  ;;  %v4654_v58 = vpack.c.bf16 %v1655_v55, %v1654_v54  ;;  %v4867_v55 = vld [vmem:[%s5316_s22] sm:$0xff] }
 0x597   : > { %4621 = vmatprep.subr.bf16.mxu0 %v4620_v59  ;;  %v4656_v59 = vpack.c.bf16 %v1673_v57, %v1672_v56  ;;  %v2005_v56 = vld [vmem:[#allocation6] sm:$0xff]  ;;  %v5070_v57 = vmov 0  }
 0x598   : > { %4864 = vset.pattern.permute.xlu0 %v5070_v57  ;;  %4865 = vset.pattern.permute.xlu1 %v5070_v57  ;;  %v2854_v57 = vld [vmem:[#allocation7 + $0x140] sm:$0xff] }
 0x599   : > { %2008 = vperm.xlu0 %4864, %v2005_v56   ;;  %v2853_v56 = vld [vmem:[#allocation7 + $0x138] sm:$0xff] }
 0x59a   : > { %4623 = vmatpush3.bf16.msra.mxu0 %v4622_v0 }
 0x59b   : > { %4625 = vmatprep.subr.bf16.mxu0 %v4624_v1 }
 0x59e   : > { %4627 = vmatpush3.bf16.msra.mxu0 %v4626_v4  ;;  %v1824_v4 = vld [vmem:[#allocation2 + $0x800] sm:$0xff] }
 0x59f   : > { %4196 = vmatprep.subr.mxu0 %v5068_v34 }
 0x5a1   : > { %1557 = vmatmul.mubr.f32.vlgmr.msra.gmra.mrb[14].mxu0 %v5319_v16 }
 0x5a2   : > { %4198 = vmatprep.mubr.msk.f32.mxu0 %vm5069_vm0, %v5068_v34 }
 0x654   : > { %v1454_v5 = vpop.f32.mrb[12].mxu0 }
 0x655   : > { %v5387_v6 = vadd.f32 %v1454_v5, %v5377_v12  ;;  %v4190_v7 = vpop.f32.mrb[13].mxu0  ;;  %v1662_v12 = vld [vmem:[#allocation2 + $0x7a0] sm:$0xff]  ;;  %v1825_v5 = vld [vmem:[#allocation2 + $0x808] sm:$0xff] }
 0x656   : > { %v4636_v30 = vpack.c.bf16 %v1663_v28, %v1662_v12  ;;  %v1847_v12 = vld [vmem:[#allocation2 + $0x8b8] sm:$0xff] }
 0x674   : > { %v3983_v13 = vpop.f32.mrb[14].mxu0 }
 0x675   : > { %v3984_v17 = vpop.f32.mrb[15].mxu0 }
 0x676   : > { %v3985_v20 = vadd.f32 %v3984_v17, %v3983_v13  ;;  %v1826_v17 = vld [vmem:[#allocation2 + $0x810] sm:$0xff] }
 0x678   : > { %4192 = vmatpush3.msk.msra.mxu1 %vm581_vm1, %v3985_v20  ;;  %v1845_v20 = vld [vmem:[#allocation2 + $0x8a8] sm:$0xff] }
 0x679   : > { %4194 = vmatmul.mubr.msk.f32.vlgmr.msra.gmra.mrb[10].mxu1 %vm577_vm2, %v1563_v22  ;;  %4629 = vmatprep.subr.bf16.mxu1 %v4628_v18  ;;  %v1827_v18 = vld [vmem:[#allocation2 + $0x818] sm:$0xff] }
 0x67a   : > { %4631 = vmatpush3.bf16.msra.mxu1 %v4630_v23  ;;  %1738 = vmatprep.mubr.f32.mxu1 %v5323_v21  ;;  %v4666_v22 = vpack.c.bf16 %v1827_v18, %v1826_v17  ;;  %v2101_v18 = vld [vmem:[#allocation7 + $0x38] sm:$0xff] }
 0x67b   : > { %4633 = vmatprep.subr.bf16.mxu1 %v4632_v24  ;;  %v1828_v24 = vld [vmem:[#allocation2 + $0x820] sm:$0xff] }
 0x67c   : > { %v4670_v28 = vpack.c.bf16 %v1829_v25, %v1828_v24  ;;  %v2103_v25 = vld [vmem:[#allocation7 + $0x48] sm:$0xff] }
 0x67e   : > { %4635 = vmatpush3.bf16.msra.mxu1 %v4634_v29  ;;  %v4672_v29 = vpack.c.bf16 %v1847_v12, %v1846_v27  ;;  %v2104_v27 = vld [vmem:[#allocation7 + $0x50] sm:$0xff] }
 0x67f   : > { %4637 = vmatprep.subr.bf16.mxu1 %v4636_v30  ;;  %v1830_v30 = vld [vmem:[#allocation2 + $0x830] sm:$0xff]  ;;  %v4705_v12 = vpack.c.bf16 %v2104_v27, %v2103_v25  ;;  %v2183_v25 = vld [vmem:[#allocation9 + $0x18] sm:$0xff] }
 0x680   : > { %v4674_v35 = vpack.c.bf16 %v1831_v31, %v1830_v30  ;;  %v2348_v31 = vld [vmem:[#allocation7 + $0x70] sm:$0xff] }
 0x682   : > { %4639 = vmatpush3.bf16.msra.mxu1 %v4638_v36  ;;  %v4676_v36 = vpack.c.bf16 %v1849_v19, %v1848_v33  ;;  %v2349_v33 = vld [vmem:[#allocation7 + $0x78] sm:$0xff]  ;;  %v2107_v19 = vld [vmem:[#allocation7 + $0x68] sm:$0x1] }
 0x683   : > { %4641 = vmatprep.subr.bf16.mxu1 %v4640_v37  ;;  %v1832_v37 = vld [vmem:[#allocation2 + $0x840] sm:$0xff] }
 0x686   : > { %4643 = vmatpush3.bf16.msra.mxu1 %v4642_v41  ;;  %v1834_v41 = vld [vmem:[#allocation2 + $0x850] sm:$0xff] }
 0x687   : > { %4645 = vmatprep.subr.bf16.mxu1 %v4644_v42  ;;  %v1835_v42 = vld [vmem:[#allocation2 + $0x858] sm:$0xff] }
 0x688   : > { %v4682_v32 = vpack.c.bf16 %v1835_v42, %v1834_v41  ;;  %v2683_v41 = vld [vmem:[#allocation7 + $0xe8] sm:$0xff]  ;;  %v2354_v42 = vld [vmem:[#allocation7 + $0xa0] sm:$0x1] }
 0x68a   : > { %4647 = vmatpush3.bf16.msra.mxu1 %v4646_v46  ;;  %v1836_v46 = vld [vmem:[#allocation2 + $0x860] sm:$0xff] }
 0x68b   : > { %4649 = vmatprep.subr.bf16.mxu1 %v4648_v47  ;;  %v1837_v47 = vld [vmem:[#allocation2 + $0x868] sm:$0xff] }
 0x68c   : > { %v4686_v50 = vpack.c.bf16 %v1837_v47, %v1836_v46  ;;  %v2686_v46 = vld [vmem:[#allocation7 + $0x100] sm:$0xff]  ;;  %v2687_v47 = vld [vmem:[#allocation7 + $0x108] sm:$0xff] }
 0x68d   : > { %v4735_v48 = vpack.c.bf16 %v2687_v47, %v2686_v46 }
 0x68e   : > { %4651 = vmatpush3.bf16.msra.mxu1 %v4650_v52  ;;  %v1838_v52 = vld [vmem:[#allocation2 + $0x870] sm:$0xff] }
 0x68f   : > { %4653 = vmatprep.subr.bf16.mxu1 %v4652_v53  ;;  %v1839_v53 = vld [vmem:[#allocation2 + $0x878] sm:$0xff] }
 0x690   : > { %v4690_v54 = vpack.c.bf16 %v1839_v53, %v1838_v52  ;;  %v2851_v53 = vld [vmem:[#allocation7 + $0x128] sm:$0xff] }
 0x692   : > { %4655 = vmatpush3.bf16.msra.mxu1 %v4654_v58  ;;  %v3516_v58 = vld [vmem:[#allocation10] sm:$0xff] }
 0x693   : > { %4657 = vmatprep.subr.bf16.mxu1 %v4656_v59  ;;  %3520 = vperm.xlu0 %4864, %v3516_v58   ;;  %v4744_v58 = vpack.c.bf16 %v2854_v57, %v2853_v56  ;;  %v3016_v56 = vld [vmem:[#allocation7 + $0x150] sm:$0xff]  ;;  %v3017_v57 = vld [vmem:[#allocation7 + $0x158] sm:$0xff] }
 0x696   : > { %4659 = vmatpush3.bf16.msra.mxu1 %v4658_v62  ;;  %v2013_v62 = vld [vmem:[#allocation7] sm:$0xff] }
 0x697   : > { %4201 = vmatprep.subr.mxu1 %v5068_v34 }
 0x699   : > { %1739 = vmatmul.mubr.f32.vlgmr.msra.gmra.mrb[12].mxu1 %v5319_v16  ;;  %v4662_v16 = vpack.c.bf16 %v1825_v5, %v1824_v4  ;;  %v1927_v4 = vld [vmem:[#allocation4 + $0x40] sm:$0xff] }
 0x69a   : > { %4203 = vmatprep.mubr.msk.f32.mxu1 %vm5069_vm0, %v5068_v34 }
 0x74c   : > { %v1636_v63 = vpop.f32.mrb[10].mxu1 }
 0x74d   : > { %v5397_v0 = vadd.f32 %v1636_v63, %v5387_v6  ;;  %v4195_v1 = vpop.f32.mrb[11].mxu1  ;;  %v1844_v6 = vld [vmem:[#allocation2 + $0x8a0] sm:$0xff]  ;;  %v2014_v63 = vld [vmem:[#allocation7 + $0x8] sm:$0xff] }
 0x74e   : > { %v4668_v23 = vpack.c.bf16 %v1845_v20, %v1844_v6  ;;  %v4693_v5 = vpack.c.bf16 %v2014_v63, %v2013_v62  ;;  %v2102_v6 = vld [vmem:[#allocation7 + $0x40] sm:$0xff]  ;;  %v2009_v20 = vpop.permute.xlu0 %2008  ;;  %v3185_v63 = vld [vmem:[#allocation7 + $0x198] sm:$0xff] }
 0x76c   : > { %v4020_v7 = vpop.f32.mrb[12].mxu1 }
 0x76d   : > { %v4021_v10 = vpop.f32.mrb[13].mxu1 }
 0x76e   : > { %v4022_v13 = vadd.f32 %v4021_v10, %v4020_v7  ;;  %v2015_v7 = vld [vmem:[#allocation7 + $0x10] sm:$0xff] }
 0x76f   : > { %v4696_v10 = vpack.c.bf16 %v2016_v8, %v2015_v7  ;;  %v3350_v7 = vld [vmem:[#allocation7 + $0x1c0] sm:$0xff]  ;;  %v3351_v8 = vld [vmem:[#allocation7 + $0x1c8] sm:$0xff] }
 0x770   : > { %4197 = vmatpush3.msk.msra.mxu0 %vm581_vm1, %v4022_v13 }
 0x771   : > { %4199 = vmatmul.mubr.msk.f32.vlgmr.msra.gmra.mrb[16].mxu0 %vm577_vm2, %v1745_v14  ;;  %4661 = vmatprep.subr.bf16.mxu0 %v4660_v11  ;;  %v2018_v11 = vld [vmem:[#allocation7 + $0x28] sm:$0xff]  ;;  %v2019_v14 = vld [vmem:[#allocation7 + $0x30] sm:$0x1] }
 0x772   : > { %4663 = vmatpush3.bf16.msra.mxu0 %v4662_v16  ;;  %1920 = vmatprep.mubr.f32.mxu0 %v5323_v21  ;;  %v1833_v21 = vld [vmem:[#allocation2 + $0x848] sm:$0xff] }
 0x773   : > { %4665 = vmatprep.subr.bf16.mxu0 %v4664_v15  ;;  %v4678_v26 = vpack.c.bf16 %v1833_v21, %v1832_v37  ;;  %v2351_v37 = vld [vmem:[#allocation7 + $0x88] sm:$0xff] }
 0x776   : > { %4667 = vmatpush3.bf16.msra.mxu0 %v4666_v22 }
 0x777   : > { %4669 = vmatprep.subr.bf16.mxu0 %v4668_v23  ;;  %v4702_v23 = vpack.c.bf16 %v2102_v6, %v2101_v18  ;;  %v3356_v18 = vld [vmem:[#allocation7 + $0x1f0] sm:$0x1]  ;;  %v2182_v6 = vld [vmem:[#allocation9 + $0x10] sm:$0xff] }
 0x77a   : > { %4671 = vmatpush3.bf16.msra.mxu0 %v4670_v28  ;;  %v2105_v28 = vld [vmem:[#allocation7 + $0x58] sm:$0xff] }
 0x77b   : > { %4673 = vmatprep.subr.bf16.mxu0 %v4672_v29  ;;  %v2106_v29 = vld [vmem:[#allocation7 + $0x60] sm:$0xff] }
 0x77c   : > { %v4708_v30 = vpack.c.bf16 %v2106_v29, %v2105_v28  ;;  %v2099_v28 = vld [vmem:[#allocation9 + $0x8] sm:$0xff]  ;;  %v2429_v29 = vld [vmem:[#allocation9 + $0x20] sm:$0xff] }
 0x77e   : > { %4675 = vmatpush3.bf16.msra.mxu0 %v4674_v35  ;;  %v4711_v35 = vpack.c.bf16 %v2349_v33, %v2348_v31  ;;  %v2516_v31 = vld [vmem:[#allocation7 + $0xb0] sm:$0xff] }
 0x77f   : > { %4677 = vmatprep.subr.bf16.mxu0 %v4676_v36  ;;  %v2350_v36 = vld [vmem:[#allocation7 + $0x80] sm:$0xff] }
 0x780   : > { %v4714_v21 = vpack.c.bf16 %v2351_v37, %v2350_v36  ;;  %v2517_v37 = vld [vmem:[#allocation7 + $0xb8] sm:$0xff] }
 0x782   : > { %4679 = vmatpush3.bf16.msra.mxu0 %v4678_v26  ;;  %v4717_v26 = vpack.c.bf16 %v2353_v39, %v2352_v38  ;;  %v2519_v39 = vld [vmem:[#allocation7 + $0xc8] sm:$0xff] }
 0x783   : > { %4681 = vmatprep.subr.bf16.mxu0 %v4680_v40  ;;  %v2682_v40 = vld [vmem:[#allocation7 + $0xe0] sm:$0xff] }
 0x784   : > { %v4729_v43 = vpack.c.bf16 %v2683_v41, %v2682_v40 }
 0x786   : > { %4683 = vmatpush3.bf16.msra.mxu0 %v4682_v32  ;;  %v2685_v32 = vld [vmem:[#allocation7 + $0xf8] sm:$0xff] }
 0x787   : > { %4685 = vmatprep.subr.bf16.mxu0 %v4684_v45  ;;  %v4732_v45 = vpack.c.bf16 %v2685_v32, %v2684_v44 }
 0x78a   : > { %4687 = vmatpush3.bf16.msra.mxu0 %v4686_v50  ;;  %v2850_v50 = vld [vmem:[#allocation7 + $0x120] sm:$0xff] }
 0x78b   : > { %4689 = vmatprep.subr.bf16.mxu0 %v4688_v51  ;;  %v2688_v51 = vld [vmem:[#allocation7 + $0x110] sm:$0x1]  ;;  %v4738_v52 = vpack.c.bf16 %v2850_v50, %v2849_v49  ;;  %v2596_v49 = vld [vmem:[#allocation9 + $0x30] sm:$0xff] }
 0x78e   : > { %4691 = vmatpush3.bf16.msra.mxu0 %v4690_v54  ;;  %v2852_v54 = vld [vmem:[#allocation7 + $0x130] sm:$0xff] }
 0x791   : > { %1921 = vmatmul.mubr.f32.vlgmr.msra.gmra.mrb[18].mxu0 %v4867_v55  ;;  %v4741_v55 = vpack.c.bf16 %v2852_v54, %v2851_v53  ;;  %v2763_v53 = vld [vmem:[#allocation9 + $0x40] sm:$0xff]  ;;  %v2764_v54 = vld [vmem:[#allocation9 + $0x48] sm:$0xff] }
 0x792   : > { %4242 = vmatprep.mubr.msk.f32.mxu0 %vm2184_vm5, %v2182_v6 }
 0x844   : > { %v1818_v59 = vpop.f32.mrb[16].mxu0 }
 0x845   : > { %v1822_v60 = vadd.f32 %v1818_v59, %v5397_v0  ;;  %v4200_v61 = vpop.f32.mrb[17].mxu0  ;;  %v2017_v0 = vld [vmem:[#allocation7 + $0x20] sm:$0xff]  ;;  %v3183_v59 = vld [vmem:[#allocation7 + $0x188] sm:$0xff] }
 0x846   : > { %v4699_v13 = vpack.c.bf16 %v2018_v11, %v2017_v0  ;;  %v2855_v61 = vld [vmem:[#allocation7 + $0x148] sm:$0x1]  ;;  %v4765_v0 = vpack.c.bf16 %v3351_v8, %v3350_v7  ;;  %v3352_v11 = vld [vmem:[#allocation7 + $0x1d0] sm:$0xff]  ;;  %v3098_v8 = vld [vmem:[#allocation9 + $0x68] sm:$0xff] }
 0x864   : > { %v4057_v1 = vpop.f32.mrb[18].mxu0 }
 0x865   : > { %v4058_v2 = vpop.f32.mrb[19].mxu0 }
 0x866   : > { %v4059_v3 = vadd.f32 %v4058_v2, %v4057_v1  ;;  %v3186_v1 = vld [vmem:[#allocation7 + $0x1a0] sm:$0xff] }
 0x867   : > { %v4759_v2 = vpack.c.bf16 %v3186_v1, %v3185_v63  ;;  %v3020_v63 = vld [vmem:[#allocation7 + $0x170] sm:$0xff]  ;;  %v3021_v1 = vld [vmem:[#allocation7 + $0x178] sm:$0xff] }
 0x868   : > { %4202 = vmatpush3.msk.msra.mxu1 %vm581_vm1, %v4059_v3  ;;  %v3187_v3 = vld [vmem:[#allocation7 + $0x1a8] sm:$0xff] }
 0x869   : > { %4204 = vmatmul.mubr.msk.f32.vlgmr.msra.gmra.mrb[14].mxu1 %vm577_vm2, %v1927_v4  ;;  %4692 = vmatprep.subr.bf16.mxu1 %v5071_v9  ;;  %v3188_v4 = vld [vmem:[#allocation7 + $0x1b0] sm:$0xff] }
 0x86a   : > { %4694 = vmatpush3.bf16.msra.mxu1 %v4693_v5  ;;  %4220 = vmatprep.mubr.msk.f32.mxu1 %vm5069_vm0, %v5068_v34  ;;  %v4762_v5 = vpack.c.bf16 %v3188_v4, %v3187_v3  ;;  %v3022_v3 = vld [vmem:[#allocation7 + $0x180] sm:$0x1]  ;;  %v3097_v4 = vld [vmem:[#allocation9 + $0x60] sm:$0xff] }
 0x86b   : > { %4695 = vmatprep.subr.bf16.mxu1 %v5071_v9 }
 0x86e   : > { %4697 = vmatpush3.bf16.msra.mxu1 %v4696_v10  ;;  %v3189_v10 = vld [vmem:[#allocation7 + $0x1b8] sm:$0x1] }
 0x86f   : > { %4698 = vmatprep.subr.bf16.mxu1 %v5071_v9 }
 0x872   : > { %4700 = vmatpush3.bf16.msra.mxu1 %v4699_v13  ;;  %v3353_v13 = vld [vmem:[#allocation7 + $0x1d8] sm:$0xff] }
 0x873   : > { %4218 = vmatprep.subr.mxu1 %v5068_v34 }
 0x876   : > { %4219 = vmatpush3.msk.msra.mxu1 %vm2024_vm3, %v2019_v14  ;;  %v4768_v14 = vpack.c.bf16 %v3353_v13, %v3352_v11 }
 0x877   : > { %4701 = vmatprep.subr.bf16.mxu1 %v5071_v9 }
 0x93c   : > { %v2000_v16 = vpop.f32.mrb[14].mxu1 }
 0x93d   : > { %v2004_v15 = vadd.f32 %v2000_v16, %v1822_v60  ;;  %v4205_v17 = vpop.f32.mrb[15].mxu1  ;;  %v3184_v60 = vld [vmem:[#allocation7 + $0x190] sm:$0xff]  ;;  %v3354_v16 = vld [vmem:[#allocation7 + $0x1e0] sm:$0xff] }
 0x93e   : > { %v4756_v62 = vpack.c.bf16 %v3184_v60, %v3183_v59  ;;  %v4747_v59 = vpack.c.bf16 %v3017_v57, %v3016_v56  ;;  %v3018_v60 = vld [vmem:[#allocation7 + $0x160] sm:$0xff] }
 0x93f   : > { %v2011_v22 = vadd.f32 %v2009_v20, %v2004_v15  ;;  %v3355_v15 = vld [vmem:[#allocation7 + $0x1e8] sm:$0xff] }
 0x940   : > { %v4771_v17 = vpack.c.bf16 %v3355_v15, %v3354_v16 }
 0x941   : > { %v5414_v24 = vmax.f32 %v2011_v22, 0.0 }
 0x943   : > { %4221 = vmatmul.mubr.msk.f32.vlgmr.msra.gmra.mrb[16].mxu1 %vm2020_vm4, %v5414_v24 }
 0x944   : > { %4703 = vmatpush3.bf16.msra.mxu1 %v4702_v23  ;;  %4237 = vmatprep.mubr.msk.f32.mxu1 %vm5069_vm0, %v5068_v34 }
 0x945   : > { %4704 = vmatprep.subr.bf16.mxu1 %v5071_v9 }
 0x948   : > { %4706 = vmatpush3.bf16.msra.mxu1 %v4705_v12  ;;  %v2098_v12 = vld [vmem:[#allocation9] sm:$0xff] }
 0x949   : > { %4707 = vmatprep.subr.bf16.mxu1 %v5071_v9 }
 0x94c   : > { %4709 = vmatpush3.bf16.msra.mxu1 %v4708_v30  ;;  %v2515_v30 = vld [vmem:[#allocation7 + $0xa8] sm:$0xff] }
 0x94d   : > { %4235 = vmatprep.subr.mxu1 %v5068_v34  ;;  %v4720_v36 = vpack.c.bf16 %v2516_v31, %v2515_v30 }
 0x950   : > { %4236 = vmatpush3.msk.msra.mxu1 %vm2024_vm3, %v2107_v19 }
 0x951   : > { %4238 = vmatmul.mubr.msk.f32.vlgmr.msra.gmra.mrb[18].mxu1 %vm2020_vm4, %v5414_v24  ;;  %4710 = vmatprep.subr.bf16.mxu1 %v5071_v9 }
 0x952   : > { %4712 = vmatpush3.bf16.msra.mxu1 %v4711_v35  ;;  %4264 = vmatprep.mubr.msk.f32.mxu1 %vm5069_vm0, %v5068_v34  ;;  %v2430_v35 = vld [vmem:[#allocation9 + $0x28] sm:$0xff] }
 0x953   : > { %4713 = vmatprep.subr.bf16.mxu1 %v5071_v9 }
 0x956   : > { %4715 = vmatpush3.bf16.msra.mxu1 %v4714_v21  ;;  %v2518_v21 = vld [vmem:[#allocation7 + $0xc0] sm:$0xff] }
 0x957   : > { %4716 = vmatprep.subr.bf16.mxu1 %v5071_v9  ;;  %v4723_v38 = vpack.c.bf16 %v2518_v21, %v2517_v37 }
 0x95a   : > { %4718 = vmatpush3.bf16.msra.mxu1 %v4717_v26  ;;  %v2520_v26 = vld [vmem:[#allocation7 + $0xd0] sm:$0xff] }
 0x95b   : > { %4262 = vmatprep.subr.mxu1 %v5068_v34  ;;  %v4726_v40 = vpack.c.bf16 %v2520_v26, %v2519_v39 }
 0x95e   : > { %4263 = vmatpush3.msk.msra.mxu1 %vm2024_vm3, %v2354_v42 }
 0x95f   : > { %4265 = vmatmul.mubr.msk.f32.vlgmr.msra.gmra.mrb[20].mxu1 %vm2020_vm4, %v5414_v24  ;;  %4728 = vmatprep.subr.bf16.mxu1 %v5071_v9 }
 0x960   : > { %4730 = vmatpush3.bf16.msra.mxu1 %v4729_v43  ;;  %4308 = vmatprep.mubr.msk.f32.mxu1 %vm5069_vm0, %v5068_v34  ;;  %v2521_v43 = vld [vmem:[#allocation7 + $0xd8] sm:$0x1] }
 0x961   : > { %4731 = vmatprep.subr.bf16.mxu1 %v5071_v9 }
 0x964   : > { %4733 = vmatpush3.bf16.msra.mxu1 %v4732_v45 }
 0x965   : > { %4734 = vmatprep.subr.bf16.mxu1 %v5071_v9 }
 0x968   : > { %4736 = vmatpush3.bf16.msra.mxu1 %v4735_v48 }
 0x969   : > { %4306 = vmatprep.subr.mxu1 %v5068_v34 }
 0x96c   : > { %4307 = vmatpush3.msk.msra.mxu1 %vm2024_vm3, %v2688_v51  ;;  %v2597_v51 = vld [vmem:[#allocation9 + $0x38] sm:$0xff] }
 0x96d   : > { %4309 = vmatmul.mubr.msk.f32.vlgmr.msra.gmra.mrb[22].mxu1 %vm2020_vm4, %v5414_v24  ;;  %4737 = vmatprep.subr.bf16.mxu1 %v5071_v9 }
 0x96e   : > { %4739 = vmatpush3.bf16.msra.mxu1 %v4738_v52  ;;  %4330 = vmatprep.mubr.msk.f32.mxu1 %vm5069_vm0, %v5068_v34 }
 0x96f   : > { %4740 = vmatprep.subr.bf16.mxu1 %v5071_v9 }
 0x972   : > { %4742 = vmatpush3.bf16.msra.mxu1 %v4741_v55  ;;  %v2930_v55 = vld [vmem:[#allocation9 + $0x50] sm:$0xff] }
 0x973   : > { %4743 = vmatprep.subr.bf16.mxu1 %v5071_v9 }
 0x976   : > { %4745 = vmatpush3.bf16.msra.mxu1 %v4744_v58  ;;  %v2931_v58 = vld [vmem:[#allocation9 + $0x58] sm:$0xff] }
 0x977   : > { %4328 = vmatprep.subr.mxu1 %v5068_v34 }
 0x97a   : > { %4329 = vmatpush3.msk.msra.mxu1 %vm2024_vm3, %v2855_v61  ;;  %v3019_v61 = vld [vmem:[#allocation7 + $0x168] sm:$0xff] }
 0x97b   : > { %4331 = vmatmul.mubr.msk.f32.vlgmr.msra.gmra.mrb[24].mxu1 %vm2020_vm4, %v5414_v24  ;;  %4755 = vmatprep.subr.bf16.mxu1 %v5071_v9 }
 0x97c   : > { %4757 = vmatpush3.bf16.msra.mxu1 %v4756_v62  ;;  %4374 = vmatprep.mubr.msk.f32.mxu1 %vm5069_vm0, %v5068_v34  ;;  %v4750_v62 = vpack.c.bf16 %v3019_v61, %v3018_v60 }
 0x97d   : > { %4758 = vmatprep.subr.bf16.mxu1 %v5071_v9 }
 0x980   : > { %4760 = vmatpush3.bf16.msra.mxu1 %v4759_v2  ;;  %v4753_v2 = vpack.c.bf16 %v3021_v1, %v3020_v63 }
 0x981   : > { %4761 = vmatprep.subr.bf16.mxu1 %v5071_v9 }
 0x984   : > { %4763 = vmatpush3.bf16.msra.mxu1 %v4762_v5  ;;  %v3517_v5 = vld [vmem:[#allocation10 + $0x8] sm:$0xff] }
 0x985   : > { %4372 = vmatprep.subr.mxu1 %v5068_v34  ;;  %3525 = vperm.xlu1 %4865, %v3517_v5  }
 0x988   : > { %4373 = vmatpush3.msk.msra.mxu1 %vm2024_vm3, %v3189_v10 }
 0x989   : > { %4375 = vmatmul.mubr.msk.f32.vlgmr.msra.gmra.mrb[26].mxu1 %vm2020_vm4, %v5414_v24  ;;  %4764 = vmatprep.subr.bf16.mxu1 %v5071_v9 }
 0x98a   : > { %4766 = vmatpush3.bf16.msra.mxu1 %v4765_v0  ;;  %4396 = vmatprep.mubr.msk.f32.mxu1 %vm5069_vm0, %v5068_v34  ;;  %v3432_v0 = vld [vmem:[#allocation9 + $0x88] sm:$0xff] }
 0x98b   : > { %4767 = vmatprep.subr.bf16.mxu1 %v5071_v9 }
 0x98e   : > { %4769 = vmatpush3.bf16.msra.mxu1 %v4768_v14  ;;  %v3521_v14 = vpop.permute.xlu0 %3520 }
 0x98f   : > { %4770 = vmatprep.subr.bf16.mxu1 %v5071_v9 }
 0x992   : > { %4772 = vmatpush3.bf16.msra.mxu1 %v4771_v17 }
 0x993   : > { %4394 = vmatprep.subr.mxu1 %v5068_v34 }
 0x996   : > { %4395 = vmatpush3.msk.msra.mxu1 %vm2024_vm3, %v3356_v18 }
 0x997   : > { %4397 = vmatmul.mubr.msk.f32.vlgmr.msra.gmra.mrb[28].mxu1 %vm2020_vm4, %v5414_v24 }
 0xa04   : > { %v3526_v11 = vpop.permute.xlu1 %3525 }
 0xa16   : > { %v2094_v20 = vpop.f32.mrb[16].mxu1 }
 0xa17   : > { %v4222_v22 = vpop.f32.mrb[17].mxu1 }
 0xa24   : > { %v2177_v23 = vpop.f32.mrb[18].mxu1 }
 0xa25   : > { %v4239_v27 = vpop.f32.mrb[19].mxu1  ;;  %4240 = vmatprep.subr.mxu0 %v2177_v23 }
 0xa26   : > { %4241 = vmatpush3.msra.mxu0 %v2177_v23 }
 0xa27   : > { %4243 = vmatmul.mubr.msk.f32.vlgmr.msra.gmra.mrb[20].mxu0 %vm2184_vm5, %v2183_v25  ;;  %4245 = vmatprep.subr.mxu0 %v2094_v20 }
 0xa28   : > { %4246 = vmatpush3.msra.mxu0 %v2094_v20  ;;  %4247 = vmatprep.mubr.msk.f32.mxu0 %vm2184_vm5, %v2098_v12 }
 0xa2f   : > { %4248 = vmatmul.mubr.msk.f32.vlgmr.msra.gmra.mrb[20].mxu0 %vm2184_vm5, %v2099_v28 }
 0xa30   : > { %4269 = vmatprep.mubr.msk.f32.mxu0 %vm2184_vm5, %v2429_v29 }
 0xa32   : > { %v2424_v33 = vpop.f32.mrb[20].mxu1 }
 0xa33   : > { %v4266_v19 = vpop.f32.mrb[21].mxu1  ;;  %4267 = vmatprep.subr.mxu0 %v2424_v33 }
 0xa34   : > { %4268 = vmatpush3.msra.mxu0 %v2424_v33 }
 0xa35   : > { %4719 = vmatprep.subr.bf16.mxu0 %v5071_v9 }
 0xa37   : > { %4270 = vmatmul.mubr.msk.f32.vlgmr.msra.gmra.mrb[20].mxu0 %vm2184_vm5, %v2430_v35 }
 0xa38   : > { %4721 = vmatpush3.bf16.msra.mxu0 %v4720_v36  ;;  %4286 = vmatprep.mubr.msk.f32.mxu0 %vm5069_vm0, %v5068_v34 }
 0xa39   : > { %4722 = vmatprep.subr.bf16.mxu0 %v5071_v9 }
 0xa3c   : > { %4724 = vmatpush3.bf16.msra.mxu0 %v4723_v38 }
 0xa3d   : > { %4725 = vmatprep.subr.bf16.mxu0 %v5071_v9 }
 0xa40   : > { %4727 = vmatpush3.bf16.msra.mxu0 %v4726_v40  ;;  %v2758_v41 = vpop.f32.mrb[22].mxu1 }
 0xa41   : > { %v4310_v42 = vpop.f32.mrb[23].mxu1  ;;  %4284 = vmatprep.subr.mxu0 %v5068_v34 }
 0xa44   : > { %4285 = vmatpush3.msk.msra.mxu0 %vm2024_vm3, %v2521_v43 }
 0xa45   : > { %4287 = vmatmul.mubr.msk.f32.vlgmr.msra.gmra.mrb[22].mxu0 %vm2020_vm4, %v5414_v24 }
 0xa46   : > { %4291 = vmatprep.mubr.msk.f32.mxu0 %vm2184_vm5, %v2596_v49 }
 0xa4e   : > { %v2925_v44 = vpop.f32.mrb[24].mxu1 }
 0xa4f   : > { %v4332_v32 = vpop.f32.mrb[25].mxu1 }
 0xa5c   : > { %v3259_v45 = vpop.f32.mrb[26].mxu1 }
 0xa5d   : > { %v4376_v46 = vpop.f32.mrb[27].mxu1 }
 0xa6a   : > { %v3426_v47 = vpop.f32.mrb[28].mxu1 }
 0xa6b   : > { %v4398_v48 = vpop.f32.mrb[29].mxu1 }
 0xb18   : > { %v2591_v50 = vpop.f32.mrb[22].mxu0 }
 0xb19   : > { %v4288_v52 = vpop.f32.mrb[23].mxu0  ;;  %4289 = vmatprep.subr.mxu0 %v2591_v50 }
 0xb1a   : > { %4290 = vmatpush3.msra.mxu0 %v2591_v50 }
 0xb1b   : > { %4292 = vmatmul.mubr.msk.f32.vlgmr.msra.gmra.mrb[20].mxu0 %vm2184_vm5, %v2597_v51  ;;  %4311 = vmatprep.subr.mxu0 %v2758_v41 }
 0xb1c   : > { %4312 = vmatpush3.msra.mxu0 %v2758_v41  ;;  %4313 = vmatprep.mubr.msk.f32.mxu0 %vm2184_vm5, %v2763_v53 }
 0xb1d   : > { %4333 = vmatprep.subr.mxu0 %v2925_v44 }
 0xb23   : > { %4314 = vmatmul.mubr.msk.f32.vlgmr.msra.gmra.mrb[20].mxu0 %vm2184_vm5, %v2764_v54 }
 0xb24   : > { %4334 = vmatpush3.msra.mxu0 %v2925_v44  ;;  %4335 = vmatprep.mubr.msk.f32.mxu0 %vm2184_vm5, %v2930_v55 }
 0xb25   : > { %4746 = vmatprep.subr.bf16.mxu0 %v5071_v9 }
 0xb2b   : > { %4336 = vmatmul.mubr.msk.f32.vlgmr.msra.gmra.mrb[20].mxu0 %vm2184_vm5, %v2931_v58 }
 0xb2c   : > { %4748 = vmatpush3.bf16.msra.mxu0 %v4747_v59  ;;  %4352 = vmatprep.mubr.msk.f32.mxu0 %vm5069_vm0, %v5068_v34 }
 0xb2d   : > { %4749 = vmatprep.subr.bf16.mxu0 %v5071_v9 }
 0xb30   : > { %4751 = vmatpush3.bf16.msra.mxu0 %v4750_v62 }
 0xb31   : > { %4752 = vmatprep.subr.bf16.mxu0 %v5071_v9  ;;  %v3264_v9 = vld [vmem:[#allocation9 + $0x70] sm:$0xff] }
 0xb34   : > { %4754 = vmatpush3.bf16.msra.mxu0 %v4753_v2 }
 0xb35   : > { %4350 = vmatprep.subr.mxu0 %v5068_v34  ;;  %v3265_v34 = vld [vmem:[#allocation9 + $0x78] sm:$0xff] }
 0xb38   : > { %4351 = vmatpush3.msk.msra.mxu0 %vm2024_vm3, %v3022_v3 }
 0xb39   : > { %4353 = vmatmul.mubr.msk.f32.vlgmr.msra.gmra.mrb[24].mxu0 %vm2020_vm4, %v5414_v24  ;;  %v3431_v24 = vld [vmem:[#allocation9 + $0x80] sm:$0xff] }
 0xb3a   : > { %4357 = vmatprep.mubr.msk.f32.mxu0 %vm2184_vm5, %v3097_v4 }
 0xc0c   : > { %v3092_v7 = vpop.f32.mrb[24].mxu0 }
 0xc0d   : > { %v4354_v10 = vpop.f32.mrb[25].mxu0  ;;  %4355 = vmatprep.subr.mxu0 %v3092_v7 }
 0xc0e   : > { %4356 = vmatpush3.msra.mxu0 %v3092_v7 }
 0xc0f   : > { %4358 = vmatmul.mubr.msk.f32.vlgmr.msra.gmra.mrb[20].mxu0 %vm2184_vm5, %v3098_v8  ;;  %4377 = vmatprep.subr.mxu0 %v3259_v45 }
 0xc10   : > { %4378 = vmatpush3.msra.mxu0 %v3259_v45  ;;  %4379 = vmatprep.mubr.msk.f32.mxu0 %vm2184_vm5, %v3264_v9 }
 0xc11   : > { %4399 = vmatprep.subr.mxu0 %v3426_v47 }
 0xc17   : > { %4380 = vmatmul.mubr.msk.f32.vlgmr.msra.gmra.mrb[20].mxu0 %vm2184_vm5, %v3265_v34 }
 0xc18   : > { %4400 = vmatpush3.msra.mxu0 %v3426_v47  ;;  %4401 = vmatprep.mubr.msk.f32.mxu0 %vm2184_vm5, %v3431_v24 }
 0xc1f   : > { %4402 = vmatmul.mubr.msk.f32.vlgmr.msra.gmra.mrb[20].mxu0 %vm2184_vm5, %v3432_v0 }
 0xcf2   : > { %v4403_v13 = vpop.f32.mrb[20].mxu0 }
 0xcf3   : > { %v3529_v16 = vadd.f32 %v4403_v13, %v3526_v11  ;;  %v3505_v15 = vpop.f32.mrb[21].mxu0 }
 0xcf4   : > { %v3528_v17 = vadd.f32 %v3521_v14, %v3505_v15 }
 0xcf5   : > { %v3531_v18 = vmax.f32 %v3529_v16, 0.0 }
 0xcf6   : > { %v3530_v6 = vmax.f32 %v3528_v17, 0.0 }
 0xcf7   : > { %3534 = vst.msk [vmem:[%s364_s27 + $0x8] sm:$0xff] %vm3532_vm6, %v3531_v18 }
 0xcf8   : > { %3533 = vst.msk [vmem:[%s364_s27] sm:$0xff] %vm3532_vm6, %v3530_v6 }
 0xcf9 PF: > { %s21_s24 = sadd.s32 1, %s5058_s24  }
 0xcfa   : > { %p18_p9 = scmp.ge.s32.totalorder %s21_s24, 4  }
 0xcfc   :  { %20 = sbr.rel (!%p18_p9) target bundleno = 4 (0x4), region = 135 }
 0xd03   :  { %3556 = vsyncpa [#allocation3], 1 }
 0xd04   :  { %3558 = vsyncpa [#allocation3 + $0x1], 1 }
 0xd05   :  { %3559 = vsyncpa [#allocation5], 1 }
 0xd06   :  { %3560 = vsyncpa [#allocation8], 1 }
 0xd07   :  { %3561 = vsyncpa [#allocation11], 1 }

</bundles_post_ra>
